<compile_context>
chip_gen: v6e
topology: v6e:2x2x1
jax: 0.10.0
libtpu: 0.0.40
codegen_flags: <defaults>
</compile_context>

<pallas_src>
import functools
import math

import jax
import jax.numpy as jnp
import numpy as np
from jax import lax
from jax.experimental import pallas as pl
from jax.experimental.pallas import tpu as pltpu


# ---------------------------------------------------------------------------
# Fused kernel: u_predict + agreement routing for one lane-dense batch tile.
# ---------------------------------------------------------------------------
def _fused_caps_kernel(x_ref, w_ref, b_ref, v_ref, *scratch,
                       oc, od, n_iterations, ic_chunk, store_u, chunk_unroll):
    """Shapes (Bt = batch tile, lives in the lane dimension):
         x_ref : (IC, ID, Bt)        input capsules for this batch tile
         w_ref : (IC, OC*OD, ID)     per-capsule weights (resident)
         b_ref : (IC, OC)            routing logits (resident)
         v_ref : (OC, OD, Bt)        output capsules for this batch tile
       scratch:
         [u_scr (IC, OC, OD, Bt)]    predictions (only when store_u)
         bb_scr (IC, OC, Bt)         per-sample routing logits, f32
    """
    if store_u:
        u_scr, bb_scr = scratch
    else:
        (bb_scr,) = scratch

    ic = x_ref.shape[0]
    bt = x_ref.shape[2]
    n_chunks = ic // ic_chunk

    def chunk_start(ci):
        return pl.multiple_of(ci * ic_chunk, ic_chunk)

    def predict_chunk_f32(c0):
        # (chunk, OCD, ID) @ (chunk, ID, Bt) -> (chunk, OCD, Bt), f32 MXU accum.
        w_c = w_ref[pl.ds(c0, ic_chunk), :, :]
        x_c = x_ref[pl.ds(c0, ic_chunk), :, :]
        u_c = jnp.einsum("cod,cdb->cob", w_c, x_c,
                         preferred_element_type=jnp.float32)
        return u_c.reshape(ic_chunk, oc, od, bt)

    def u_chunk_f32(ci):
        c0 = chunk_start(ci)
        if store_u:
            return u_scr[pl.ds(c0, ic_chunk), :, :, :].astype(jnp.float32)
        # Recompute path (huge layers on small-VMEM chips): x / w are resident.
        return predict_chunk_f32(c0)

    # ---- init: per-sample routing logits; predictions (if kept resident) ----
    bb_scr[...] = jnp.broadcast_to(
        b_ref[...].astype(jnp.float32)[:, :, None], (ic, oc, bt))

    if store_u:
        def pred_body(ci, carry):
            c0 = chunk_start(ci)
            u_scr[pl.ds(c0, ic_chunk), :, :, :] = (
                predict_chunk_f32(c0).astype(u_scr.dtype))
            return carry
        lax.fori_loop(0, n_chunks, pred_body, 0, unroll=chunk_unroll)

    # ---- routing helpers -----------------------------------------------------
    def softmax_oc(logits):                       # softmax over the OC axis (=1)
        m = jnp.max(logits, axis=1, keepdims=True)
        e = jnp.exp(logits - m)
        return e * pl.reciprocal(jnp.sum(e, axis=1, keepdims=True), approx=True)

    def squash(s):                                # s: (OC, OD, Bt), squash over OD
        n2 = jnp.sum(s * s, axis=1, keepdims=True)
        # exact reciprocal here (accuracy); rsqrt on the EUP.
        return s * ((n2 / (1.0 + n2)) * lax.rsqrt(n2 + 1e-9))

    def compute_v():
        def body(ci, s_acc):
            c0 = chunk_start(ci)
            c_c = softmax_oc(bb_scr[pl.ds(c0, ic_chunk), :, :])   # (chunk, OC, Bt)
            u_c = u_chunk_f32(ci)                                 # (chunk, OC, OD, Bt)
            return s_acc + jnp.sum(c_c[:, :, None, :] * u_c, axis=0)
        s = lax.fori_loop(0, n_chunks, body,
                          jnp.zeros((oc, od, bt), jnp.float32),
                          unroll=chunk_unroll)
        return squash(s)

    v = compute_v()

    def routing_body(_, v):
        def agree(ci, carry):
            c0 = chunk_start(ci)
            u_c = u_chunk_f32(ci)
            delta = jnp.sum(u_c * v[None, :, :, :], axis=2)       # (chunk, OC, Bt)
            bb_scr[pl.ds(c0, ic_chunk), :, :] = (
                bb_scr[pl.ds(c0, ic_chunk), :, :] + delta)
            return carry
        lax.fori_loop(0, n_chunks, agree, 0, unroll=chunk_unroll)
        return compute_v()

    v = lax.fori_loop(0, n_iterations, routing_body, v)
    v_ref[...] = v.astype(v_ref.dtype)


# ---------------------------------------------------------------------------
# VMEM accounting and tile selection
# ---------------------------------------------------------------------------
def _round_up(x, m):
    return ((x + m - 1) // m) * m


def _padded_bytes(shape, dtype):
    """VMEM footprint of an array including (sublane, lane) layout padding."""
    itemsize = jnp.dtype(dtype).itemsize
    dims = list(shape)
    if dims:
        dims[-1] = _round_up(dims[-1], 128)
    if len(dims) >= 2:
        dims[-2] = _round_up(dims[-2], 8 * max(1, 4 // itemsize))
    n = itemsize
    for d in dims:
        n *= d
    return n


def _vmem_capacity_bytes():
    try:
        cap = int(pltpu.get_tpu_info().vmem_capacity_bytes)
        if cap >= (16 << 20):
            return cap
    except Exception:
        pass
    return 64 << 20        # conservative fallback (v7x per-core VMEM)


def _pick_ic_chunk(ic, max_chunk=32):
    for c in range(min(ic, max_chunk), 0, -1):
        if ic % c == 0:
            return c
    return 1


def _footprint_bytes(bt, ic, idim, oc, od, ic_chunk,
                     in_dtype, u_dtype, out_dtype, store_u):
    ocd = oc * od
    total = 0
    # Pipelined input / output blocks (double-buffered by Pallas).
    total += 2 * _padded_bytes((ic, idim, bt), in_dtype)
    total += 2 * _padded_bytes((oc, od, bt), out_dtype)
    # Resident operands (constant index_map).  We keep the default pipeline
    # buffering (well-trodden lowering path) and charge 2x here instead of
    # relying on pl.Buffered(1).
    total += 2 * _padded_bytes((ic, ocd, idim), in_dtype)
    total += 2 * _padded_bytes((ic, oc), jnp.float32)
    # Scratch.
    if store_u:
        total += _padded_bytes((ic, oc, od, bt), u_dtype)
    total += _padded_bytes((ic, oc, bt), jnp.float32)                 # bb
    # Chunk-sized routing temporaries + s/v accumulators + bb-init temp.
    total += 3 * _padded_bytes((ic_chunk, oc, od, bt), jnp.float32)
    total += 3 * _padded_bytes((ic_chunk, oc, bt), jnp.float32)
    total += 4 * _padded_bytes((oc, od, bt), jnp.float32)
    total += _padded_bytes((ic, oc, bt), jnp.float32)
    return total


def _pick_batch_tile(b_padded, footprint_fn, budget):
    cands = [t for t in range(128, b_padded + 1, 128) if b_padded % t == 0]
    fitting = [t for t in cands if footprint_fn(t) <= budget]
    if not fitting:
        return None
    best = max(fitting)
    # Prefer >=2 grid steps so a dual-TensorCore chip (v7x) can split them.
    if best == b_padded and b_padded >= 256:
        smaller = [t for t in fitting if t < b_padded]
        if smaller:
            best = max(smaller)
    return best


# ---------------------------------------------------------------------------
# Wrapper: full CapsLayer forward
# ---------------------------------------------------------------------------
def caps_layer_forward(x, weights, b_routing, n_iterations, *,
                       compute_dtype=jnp.bfloat16):
    """x: (B, IC, ID), weights: (IC, ID, OC*OD), b_routing: (IC, OC)
       -> v: (B, OC, OD), in x.dtype.

    compute_dtype: MXU / u-storage dtype (default bf16; accumulation is always
    f32).  Pass None to keep everything f32 (recommended on v5e)."""
    B, IC, ID = x.shape
    OC = b_routing.shape[1]
    OCD = weights.shape[2]
    OD = OCD // OC
    assert OC * OD == OCD

    out_dtype = jnp.dtype(x.dtype)
    in_dtype = jnp.dtype(compute_dtype) if compute_dtype is not None else out_dtype
    u_dtype = in_dtype if in_dtype.itemsize < 4 else jnp.dtype(jnp.float32)

    x_c = x.astype(in_dtype)
    w_c = weights.astype(in_dtype)

    # Layout plumbing on the small tensors only: batch -> lanes, weights ->
    # (M, K) per capsule.  The big u tensor never leaves VMEM.
    x_t = jnp.transpose(x_c, (1, 2, 0))                     # (IC, ID, B)
    w_t = jnp.transpose(w_c, (0, 2, 1))                     # (IC, OCD, ID)

    # Pad batch to a lane-full multiple of 128 (zero samples squash to 0).
    Bp = max(128, _round_up(B, 128))
    if Bp != B:
        x_t = jnp.pad(x_t, ((0, 0), (0, 0), (0, Bp - B)))

    ic_chunk = _pick_ic_chunk(IC)
    capacity = _vmem_capacity_bytes()
    budget = int(capacity * 0.82)                            # ~52 MiB v7x, ~105 MiB v5e/v6e

    def fp(bt, keep_u):
        return _footprint_bytes(bt, IC, ID, OC, OD, ic_chunk,
                                in_dtype, u_dtype, out_dtype, keep_u)

    store_u = True
    Bt = _pick_batch_tile(Bp, lambda t: fp(t, True), budget)
    if Bt is None:
        store_u = False                                      # recompute-u fallback
        Bt = _pick_batch_tile(Bp, lambda t: fp(t, False), budget)
    if Bt is None:
        raise ValueError(
            f"CapsLayer tile does not fit VMEM (capacity={capacity >> 20} MiB): "
            f"IC={IC}, ID={ID}, OC*OD={OCD}. Shrink the layer or shard IC.")

    grid = (Bp // Bt,)
    n_chunks = IC // ic_chunk
    chunk_unroll = True if n_chunks <= 8 else 4

    kernel = functools.partial(
        _fused_caps_kernel, oc=OC, od=OD, n_iterations=n_iterations,
        ic_chunk=ic_chunk, store_u=store_u, chunk_unroll=chunk_unroll)

    scratch_shapes = []
    if store_u:
        scratch_shapes.append(pltpu.VMEM((IC, OC, OD, Bt), u_dtype))
    scratch_shapes.append(pltpu.VMEM((IC, OC, Bt), jnp.float32))

    n_pred = 1 if store_u else (2 * n_iterations + 1)
    flops = (2 * IC * ID * OCD * Bp * n_pred
             + (2 * n_iterations + 1) * 3 * IC * OCD * Bp)
    transcendentals = (n_iterations + 1) * IC * OC * Bp
    bytes_accessed = (x_t.size * x_t.dtype.itemsize
                      + w_t.size * w_t.dtype.itemsize
                      + b_routing.size * b_routing.dtype.itemsize
                      + OC * OD * Bp * out_dtype.itemsize)

    v_t = pl.pallas_call(
        kernel,
        out_shape=jax.ShapeDtypeStruct((OC, OD, Bp), out_dtype),
        grid=grid,
        in_specs=[
            pl.BlockSpec((IC, ID, Bt), lambda i: (0, 0, i)),      # x: batch tile
            pl.BlockSpec((IC, OCD, ID), lambda i: (0, 0, 0)),     # weights: resident
            pl.BlockSpec((IC, OC), lambda i: (0, 0)),             # logits: resident
        ],
        out_specs=pl.BlockSpec((OC, OD, Bt), lambda i: (0, 0, i)),
        scratch_shapes=scratch_shapes,
        compiler_params=pltpu.CompilerParams(
            dimension_semantics=("parallel",),
            vmem_limit_bytes=int(capacity * 0.9),
        ),
        cost_estimate=pl.CostEstimate(
            flops=int(flops),
            transcendentals=int(transcendentals),
            bytes_accessed=int(bytes_accessed)),
    )(x_t, w_t, b_routing)

    v = jnp.transpose(v_t, (2, 0, 1))                        # (Bp, OC, OD) — tiny
    return v[:B] if Bp != B else v


# ---------------------------------------------------------------------------
# Pure-JAX reference (mirrors the PyTorch CapsLayer + AgreementRouting)
# ---------------------------------------------------------------------------
def caps_layer_ref(x, weights, b_routing, n_iterations):
    B, IC, ID = x.shape
    OC = b_routing.shape[1]
    OD = weights.shape[2] // OC
    u = jnp.einsum("bif,ifo->bio", x, weights).reshape(B, IC, OC, OD)

    def squash(s):
        n2 = jnp.sum(s * s, axis=-1, keepdims=True)
        return s * (n2 / (1.0 + n2) / jnp.sqrt(n2 + 1e-9))

    c = jax.nn.softmax(b_routing, axis=1)
    s = jnp.sum(c[None, :, :, None] * u, axis=1)
    v = squash(s)
    bb = jnp.broadcast_to(b_routing, (B, IC, OC))
    for _ in range(n_iterations):
        bb = bb + jnp.sum(u * v[:, None, :, :], axis=-1)
        c = jax.nn.softmax(bb, axis=-1)
        s = jnp.sum(c[..., None] * u, axis=1)
        v = squash(s)
    return v


if __name__ == "__main__":
    # Small shapes consistent with the module's forward: caps_output (B, IC, ID).
    IC, ID, OC, OD = 8, 16, 4, 8
    n_iterations = 3

    key = jax.random.PRNGKey(0)
    k_w, k_x, k_b = jax.random.split(key, 3)

    # reset_parameters(): weights ~ U(-1/sqrt(IC), 1/sqrt(IC)); b is a learned
    # routing logit (zeros at init — small random here to exercise the softmax).
    stdv = 1.0 / math.sqrt(IC)
    weights = jax.random.uniform(k_w, (IC, ID, OC * OD), jnp.float32, -stdv, stdv)
    b_routing = 0.1 * jax.random.normal(k_b, (IC, OC), jnp.float32)

    # Case 1: tiny batch (exercises lane padding, single grid step).
    B1 = 4
    x1 = jax.random.normal(k_x, (B1, IC, ID), jnp.float32)
    v1 = caps_layer_forward(x1, weights, b_routing, n_iterations)
    jax.block_until_ready(v1)
    assert v1.shape == (B1, OC, OD) and v1.dtype == x1.dtype
    np.testing.assert_allclose(
        np.asarray(v1, dtype=np.float32),
        np.asarray(caps_layer_ref(x1, weights, b_routing, n_iterations)),
        rtol=2e-2, atol=2e-2)

    # Case 2: lane-full batch (exercises multi-tile grid / dual-core split).
    B2 = 256
    x2 = jax.random.normal(jax.random.PRNGKey(1), (B2, IC, ID), jnp.float32)
    v2 = caps_layer_forward(x2, weights, b_routing, n_iterations)
    jax.block_until_ready(v2)
    assert v2.shape == (B2, OC, OD) and v2.dtype == x2.dtype
    np.testing.assert_allclose(
        np.asarray(v2, dtype=np.float32),
        np.asarray(caps_layer_ref(x2, weights, b_routing, n_iterations)),
        rtol=2e-2, atol=2e-2)

    print("KERNEL_OK")
</pallas_src>

<mosaic_0001>
module attributes {stable_mosaic.version = 11 : i64} {
  func.func @_fused_caps_kernel(%arg0: i32, %arg1: memref<8x16x128xbf16, #tpu.memory_space<vmem>>, %arg2: memref<8x32x16xbf16, #tpu.memory_space<vmem>>, %arg3: memref<8x4xf32, #tpu.memory_space<vmem>>, %arg4: memref<4x8x128xf32, #tpu.memory_space<vmem>>, %arg5: memref<8x4x8x128xbf16, #tpu.memory_space<vmem>>, %arg6: memref<8x4x128xf32, #tpu.memory_space<vmem>>) attributes {dimension_semantics = [#tpu.dimension_semantics<parallel>], iteration_bounds = array<i64: 1>, scalar_prefetch = 0 : i64, scratch_operands = 2 : i64, tpu.core_type = #tpu.core_type<tc>, window_params = [{transform_indices = @transform_0, window_bounds = array<i64: 8, 16, 128>}, {pipeline_mode = #tpu.pipeline_mode<synchronous>, transform_indices = @transform_1, window_bounds = array<i64: 8, 32, 16>}, {pipeline_mode = #tpu.pipeline_mode<synchronous>, transform_indices = @transform_2, window_bounds = array<i64: 8, 4>}, {transform_indices = @transform_3, window_bounds = array<i64: 4, 8, 128>}]} {
    %c0 = arith.constant 0 : index
    %c0_0 = arith.constant 0 : index
    %0 = vector.load %arg3[%c0, %c0_0] : memref<8x4xf32, #tpu.memory_space<vmem>>, vector<8x4xf32>
    %1 = vector.shape_cast %0 : vector<8x4xf32> to vector<8x4x1xf32>
    %2 = vector.shape_cast %1 : vector<8x4x1xf32> to vector<8x4x1xf32>
    %3 = vector.broadcast %2 : vector<8x4x1xf32> to vector<8x4x128xf32>
    %c0_1 = arith.constant 0 : index
    %c0_2 = arith.constant 0 : index
    %c0_3 = arith.constant 0 : index
    %4 = vector.load %arg6[%c0_1, %c0_2, %c0_3] : memref<8x4x128xf32, #tpu.memory_space<vmem>>, vector<8x4x128xf32>
    tpu.vector_store %arg6[%c0_1, %c0_2, %c0_3], %3 {strides = array<i32>} : memref<8x4x128xf32, #tpu.memory_space<vmem>>, vector<8x4x128xf32>,
    %c0_i32 = arith.constant 0 : i32
    %c8_i32 = arith.constant 8 : i32
    %5 = arith.muli %c0_i32, %c8_i32 : i32
    %6 = tpu.assume_multiple %5, 8 : i32
    %7 = arith.index_cast %6 : i32 to index
    %c0_4 = arith.constant 0 : index
    %c0_5 = arith.constant 0 : index
    %8 = vector.load %arg2[%7, %c0_4, %c0_5] : memref<8x32x16xbf16, #tpu.memory_space<vmem>>, vector<8x32x16xbf16>
    %9 = arith.index_cast %6 : i32 to index
    %c0_6 = arith.constant 0 : index
    %c0_7 = arith.constant 0 : index
    %10 = vector.load %arg1[%9, %c0_6, %c0_7] : memref<8x16x128xbf16, #tpu.memory_space<vmem>>, vector<8x16x128xbf16>
    "tpu.trace_start"() <{level = 10 : i32, message = "cod,cdb->cob"}> : () -> ()
    %cst = arith.constant dense<0.000000e+00> : vector<8x32x128xf32>
    %11 = tpu.matmul %8, %10, %cst {dimension_numbers = #tpu.dot_dimension_numbers<[2], [1], [1], [2], [0, 0, 0, 1, 1, 2], [0], [0]>} : vector<8x32x16xbf16>, vector<8x16x128xbf16>, vector<8x32x128xf32> -> vector<8x32x128xf32>
    "tpu.trace_stop"() : () -> ()
    %12 = vector.shape_cast %11 : vector<8x32x128xf32> to vector<8x4x8x128xf32>
    %13 = arith.truncf %12 : vector<8x4x8x128xf32> to vector<8x4x8x128xbf16>
    %14 = arith.index_cast %6 : i32 to index
    %c0_8 = arith.constant 0 : index
    %c0_9 = arith.constant 0 : index
    %c0_10 = arith.constant 0 : index
    %15 = vector.load %arg5[%14, %c0_8, %c0_9, %c0_10] : memref<8x4x8x128xbf16, #tpu.memory_space<vmem>>, vector<8x4x8x128xbf16>
    tpu.vector_store %arg5[%14, %c0_8, %c0_9, %c0_10], %13 {strides = array<i32>} : memref<8x4x8x128xbf16, #tpu.memory_space<vmem>>, vector<8x4x8x128xbf16>,
    %c1_i32 = arith.constant 1 : i32
    %cst_11 = arith.constant 0.000000e+00 : f32
    %16 = vector.broadcast %cst_11 : f32 to vector<4x8x128xf32>
    %c0_i32_12 = arith.constant 0 : i32
    %c8_i32_13 = arith.constant 8 : i32
    %17 = arith.muli %c0_i32_12, %c8_i32_13 : i32
    %18 = tpu.assume_multiple %17, 8 : i32
    %19 = arith.index_cast %18 : i32 to index
    %c0_14 = arith.constant 0 : index
    %c0_15 = arith.constant 0 : index
    %20 = vector.load %arg6[%19, %c0_14, %c0_15] : memref<8x4x128xf32, #tpu.memory_space<vmem>>, vector<8x4x128xf32>
    %cst_16 = arith.constant dense<0xFF800000> : vector<8x128xf32>
    %21 = vector.multi_reduction <maximumf>, %20, %cst_16 [1] : vector<8x4x128xf32> to vector<8x128xf32>
    %22 = vector.shape_cast %21 : vector<8x128xf32> to vector<8x1x128xf32>
    %23 = vector.broadcast %22 : vector<8x1x128xf32> to vector<8x4x128xf32>
    %24 = arith.subf %20, %23 : vector<8x4x128xf32>
    %25 = math.exp %24 : vector<8x4x128xf32>
    %cst_17 = arith.constant dense<0.000000e+00> : vector<8x128xf32>
    %26 = vector.multi_reduction <add>, %25, %cst_17 [1] : vector<8x4x128xf32> to vector<8x128xf32>
    %27 = vector.shape_cast %26 : vector<8x128xf32> to vector<8x1x128xf32>
    %28 = tpu.reciprocal %27 {approx = true} : vector<8x1x128xf32> -> vector<8x1x128xf32>
    %29 = vector.broadcast %28 : vector<8x1x128xf32> to vector<8x4x128xf32>
    %30 = arith.mulf %25, %29 : vector<8x4x128xf32>
    %c8_i32_18 = arith.constant 8 : i32
    %31 = arith.muli %c0_i32_12, %c8_i32_18 : i32
    %32 = tpu.assume_multiple %31, 8 : i32
    %33 = arith.index_cast %32 : i32 to index
    %c0_19 = arith.constant 0 : index
    %c0_20 = arith.constant 0 : index
    %c0_21 = arith.constant 0 : index
    %34 = vector.load %arg5[%33, %c0_19, %c0_20, %c0_21] : memref<8x4x8x128xbf16, #tpu.memory_space<vmem>>, vector<8x4x8x128xbf16>
    %35 = arith.extf %34 : vector<8x4x8x128xbf16> to vector<8x4x8x128xf32>
    %36 = vector.shape_cast %30 : vector<8x4x128xf32> to vector<8x4x1x128xf32>
    %37 = vector.broadcast %36 : vector<8x4x1x128xf32> to vector<8x4x8x128xf32>
    %38 = arith.mulf %37, %35 : vector<8x4x8x128xf32>
    %cst_22 = arith.constant dense<0.000000e+00> : vector<4x8x128xf32>
    %39 = vector.multi_reduction <add>, %38, %cst_22 [0] : vector<8x4x8x128xf32> to vector<4x8x128xf32>
    %40 = arith.addf %16, %39 : vector<4x8x128xf32>
    %c1_i32_23 = arith.constant 1 : i32
    %41 = arith.mulf %40, %40 : vector<4x8x128xf32>
    %cst_24 = arith.constant dense<0.000000e+00> : vector<4x128xf32>
    %42 = vector.multi_reduction <add>, %41, %cst_24 [1] : vector<4x8x128xf32> to vector<4x128xf32>
    %43 = vector.shape_cast %42 : vector<4x128xf32> to vector<4x1x128xf32>
    %cst_25 = arith.constant 1.000000e+00 : f32
    %44 = vector.broadcast %cst_25 : f32 to vector<4x1x128xf32>
    %45 = arith.addf %44, %43 : vector<4x1x128xf32>
    %46 = arith.divf %43, %45 : vector<4x1x128xf32>
    %cst_26 = arith.constant 9.99999971E-10 : f32
    %47 = vector.broadcast %cst_26 : f32 to vector<4x1x128xf32>
    %48 = arith.addf %43, %47 : vector<4x1x128xf32>
    %49 = math.rsqrt %48 : vector<4x1x128xf32>
    %50 = arith.mulf %46, %49 : vector<4x1x128xf32>
    %51 = vector.broadcast %50 : vector<4x1x128xf32> to vector<4x8x128xf32>
    %52 = arith.mulf %40, %51 : vector<4x8x128xf32>
    %c0_i32_27 = arith.constant 0 : i32
    %c3_i32 = arith.constant 3 : i32
    %53 = arith.addi %c0_i32_27, %c3_i32 : i32
    %c1_i32_28 = arith.constant 1 : i32
    %54 = scf.for %arg7 = %c0_i32_27 to %53 step %c1_i32_28 iter_args(%arg8 = %52) -> (vector<4x8x128xf32>)  : i32 {
      %c0_i32_32 = arith.constant 0 : i32
      %c8_i32_33 = arith.constant 8 : i32
      %56 = arith.muli %c0_i32_32, %c8_i32_33 : i32
      %57 = tpu.assume_multiple %56, 8 : i32
      %c8_i32_34 = arith.constant 8 : i32
      %58 = arith.muli %c0_i32_32, %c8_i32_34 : i32
      %59 = tpu.assume_multiple %58, 8 : i32
      %60 = arith.index_cast %59 : i32 to index
      %c0_35 = arith.constant 0 : index
      %c0_36 = arith.constant 0 : index
      %c0_37 = arith.constant 0 : index
      %61 = vector.load %arg5[%60, %c0_35, %c0_36, %c0_37] : memref<8x4x8x128xbf16, #tpu.memory_space<vmem>>, vector<8x4x8x128xbf16>
      %62 = arith.extf %61 : vector<8x4x8x128xbf16> to vector<8x4x8x128xf32>
      %63 = vector.shape_cast %arg8 : vector<4x8x128xf32> to vector<1x4x8x128xf32>
      %64 = vector.broadcast %63 : vector<1x4x8x128xf32> to vector<8x4x8x128xf32>
      %65 = arith.mulf %62, %64 : vector<8x4x8x128xf32>
      %cst_38 = arith.constant dense<0.000000e+00> : vector<8x4x128xf32>
      %66 = vector.multi_reduction <add>, %65, %cst_38 [2] : vector<8x4x8x128xf32> to vector<8x4x128xf32>
      %67 = arith.index_cast %57 : i32 to index
      %c0_39 = arith.constant 0 : index
      %c0_40 = arith.constant 0 : index
      %68 = vector.load %arg6[%67, %c0_39, %c0_40] : memref<8x4x128xf32, #tpu.memory_space<vmem>>, vector<8x4x128xf32>
      %69 = arith.addf %68, %66 : vector<8x4x128xf32>
      %70 = arith.index_cast %57 : i32 to index
      %c0_41 = arith.constant 0 : index
      %c0_42 = arith.constant 0 : index
      %71 = vector.load %arg6[%70, %c0_41, %c0_42] : memref<8x4x128xf32, #tpu.memory_space<vmem>>, vector<8x4x128xf32>
      tpu.vector_store %arg6[%70, %c0_41, %c0_42], %69 {strides = array<i32>} : memref<8x4x128xf32, #tpu.memory_space<vmem>>, vector<8x4x128xf32>,
      %c1_i32_43 = arith.constant 1 : i32
      %cst_44 = arith.constant 0.000000e+00 : f32
      %72 = vector.broadcast %cst_44 : f32 to vector<4x8x128xf32>
      %c0_i32_45 = arith.constant 0 : i32
      %c8_i32_46 = arith.constant 8 : i32
      %73 = arith.muli %c0_i32_45, %c8_i32_46 : i32
      %74 = tpu.assume_multiple %73, 8 : i32
      %75 = arith.index_cast %74 : i32 to index
      %c0_47 = arith.constant 0 : index
      %c0_48 = arith.constant 0 : index
      %76 = vector.load %arg6[%75, %c0_47, %c0_48] : memref<8x4x128xf32, #tpu.memory_space<vmem>>, vector<8x4x128xf32>
      %cst_49 = arith.constant dense<0xFF800000> : vector<8x128xf32>
      %77 = vector.multi_reduction <maximumf>, %76, %cst_49 [1] : vector<8x4x128xf32> to vector<8x128xf32>
      %78 = vector.shape_cast %77 : vector<8x128xf32> to vector<8x1x128xf32>
      %79 = vector.broadcast %78 : vector<8x1x128xf32> to vector<8x4x128xf32>
      %80 = arith.subf %76, %79 : vector<8x4x128xf32>
      %81 = math.exp %80 : vector<8x4x128xf32>
      %cst_50 = arith.constant dense<0.000000e+00> : vector<8x128xf32>
      %82 = vector.multi_reduction <add>, %81, %cst_50 [1] : vector<8x4x128xf32> to vector<8x128xf32>
      %83 = vector.shape_cast %82 : vector<8x128xf32> to vector<8x1x128xf32>
      %84 = tpu.reciprocal %83 {approx = true} : vector<8x1x128xf32> -> vector<8x1x128xf32>
      %85 = vector.broadcast %84 : vector<8x1x128xf32> to vector<8x4x128xf32>
      %86 = arith.mulf %81, %85 : vector<8x4x128xf32>
      %c8_i32_51 = arith.constant 8 : i32
      %87 = arith.muli %c0_i32_45, %c8_i32_51 : i32
      %88 = tpu.assume_multiple %87, 8 : i32
      %89 = arith.index_cast %88 : i32 to index
      %c0_52 = arith.constant 0 : index
      %c0_53 = arith.constant 0 : index
      %c0_54 = arith.constant 0 : index
      %90 = vector.load %arg5[%89, %c0_52, %c0_53, %c0_54] : memref<8x4x8x128xbf16, #tpu.memory_space<vmem>>, vector<8x4x8x128xbf16>
      %91 = arith.extf %90 : vector<8x4x8x128xbf16> to vector<8x4x8x128xf32>
      %92 = vector.shape_cast %86 : vector<8x4x128xf32> to vector<8x4x1x128xf32>
      %93 = vector.broadcast %92 : vector<8x4x1x128xf32> to vector<8x4x8x128xf32>
      %94 = arith.mulf %93, %91 : vector<8x4x8x128xf32>
      %cst_55 = arith.constant dense<0.000000e+00> : vector<4x8x128xf32>
      %95 = vector.multi_reduction <add>, %94, %cst_55 [0] : vector<8x4x8x128xf32> to vector<4x8x128xf32>
      %96 = arith.addf %72, %95 : vector<4x8x128xf32>
      %c1_i32_56 = arith.constant 1 : i32
      %97 = arith.mulf %96, %96 : vector<4x8x128xf32>
      %cst_57 = arith.constant dense<0.000000e+00> : vector<4x128xf32>
      %98 = vector.multi_reduction <add>, %97, %cst_57 [1] : vector<4x8x128xf32> to vector<4x128xf32>
      %99 = vector.shape_cast %98 : vector<4x128xf32> to vector<4x1x128xf32>
      %cst_58 = arith.constant 1.000000e+00 : f32
      %100 = vector.broadcast %cst_58 : f32 to vector<4x1x128xf32>
      %101 = arith.addf %100, %99 : vector<4x1x128xf32>
      %102 = arith.divf %99, %101 : vector<4x1x128xf32>
      %cst_59 = arith.constant 9.99999971E-10 : f32
      %103 = vector.broadcast %cst_59 : f32 to vector<4x1x128xf32>
      %104 = arith.addf %99, %103 : vector<4x1x128xf32>
      %105 = math.rsqrt %104 : vector<4x1x128xf32>
      %106 = arith.mulf %102, %105 : vector<4x1x128xf32>
      %107 = vector.broadcast %106 : vector<4x1x128xf32> to vector<4x8x128xf32>
      %108 = arith.mulf %96, %107 : vector<4x8x128xf32>
      scf.yield %108 : vector<4x8x128xf32>
    }
    %c0_29 = arith.constant 0 : index
    %c0_30 = arith.constant 0 : index
    %c0_31 = arith.constant 0 : index
    %55 = vector.load %arg4[%c0_29, %c0_30, %c0_31] : memref<4x8x128xf32, #tpu.memory_space<vmem>>, vector<4x8x128xf32>
    tpu.vector_store %arg4[%c0_29, %c0_30, %c0_31], %54 {strides = array<i32>} : memref<4x8x128xf32, #tpu.memory_space<vmem>>, vector<4x8x128xf32>,
    return
  }
  func.func @transform_0(%arg0: i32) -> (i32, i32, i32) {
    %c0_i32 = arith.constant 0 : i32
    %c0_i32_0 = arith.constant 0 : i32
    %c0_i32_1 = arith.constant 0 : i32
    return %c0_i32, %c0_i32_0, %arg0 : i32, i32, i32
  }
  func.func @transform_1(%arg0: i32) -> (i32, i32, i32) {
    %c0_i32 = arith.constant 0 : i32
    %c0_i32_0 = arith.constant 0 : i32
    %c0_i32_1 = arith.constant 0 : i32
    %c0_i32_2 = arith.constant 0 : i32
    return %c0_i32, %c0_i32_0, %c0_i32_1 : i32, i32, i32
  }
  func.func @transform_2(%arg0: i32) -> (i32, i32) {
    %c0_i32 = arith.constant 0 : i32
    %c0_i32_0 = arith.constant 0 : i32
    %c0_i32_1 = arith.constant 0 : i32
    return %c0_i32, %c0_i32_0 : i32, i32
  }
  func.func @transform_3(%arg0: i32) -> (i32, i32, i32) {
    %c0_i32 = arith.constant 0 : i32
    %c0_i32_0 = arith.constant 0 : i32
    %c0_i32_1 = arith.constant 0 : i32
    return %c0_i32, %c0_i32_0, %arg0 : i32, i32, i32
  }
}

</mosaic_0001>

<bundles_post_ra>
// kernel: tpu_custom_call.1
= control target key start
LH: loop header
LB: loop body
LE: loop exit
PB: predicated region body
PF: predicated region fallthrough
CT: control target
= control target key end

     0   :  { %8 = vsyncpa [#allocation5], 0  ;;  %v17_v0 = vlaneseq  ;;  %vm151_vm0 = vcmask 130048   ;;  %vm779_vm1 = vcmask 1043456   ;;  %s4253_s0 = inlined_call_operand.vmem [shape: bf16[8,16,128], index: 0, kind: input, shape index: {}]   ;;  %s4254_s1 = inlined_call_operand.vmem [shape: bf16[8,32,16], index: 1, kind: input, shape index: {}]   ;;  %s4255_s2 = inlined_call_operand.vmem [shape: f32[8,4], index: 2, kind: input, shape index: {}]   ;;  %s4256_s3 = inlined_call_operand.hbm [shape: f32[4,8,128], index: 3, kind: output, shape index: {}]  }
   0x1   :  { %v3094_v1 = vld [vmem:[%s4253_s0] sm:$0xff]   ;;  %v3095_v2 = vld [vmem:[%s4253_s0 + $0x8] sm:$0xff]   ;;  %v3097_v5 = vld [vmem:[%s4254_s1 + $0x10] sm:$0xff]  }
   0x2   :  { %v3306_v3 = vshrl.u32 %v17_v0, 7  ;;  %3002 = vmatprep.subr.bf16.mxu0 %v3094_v1  ;;  %v3096_v4 = vld [vmem:[%s4254_s1] sm:$0xff]   ;;  %3008 = vmatprep.subr.bf16.mxu1 %v3095_v2  ;;  %v3098_v7 = vld [vmem:[%s4254_s1 + $0x8] sm:$0xff]   ;;  %v3099_v9 = vld [vmem:[%s4254_s1 + $0x18] sm:$0xff]  }
   0x3   :  { %3003 = vmatpush3.bf16.msra.mxu0 %v3094_v1  ;;  %3009 = vmatpush3.bf16.msra.mxu1 %v3095_v2  ;;  %v3100_v11 = vld [vmem:[%s4253_s0 + $0x10] sm:$0xff]   ;;  %v16_v12 = vld [vmem:[%s4255_s2] sm:$0xff]  ;;  %v3101_v15 = vld [vmem:[%s4253_s0 + $0x18] sm:$0xff]  }
   0x4   :  { %v3315_v6 = vsub.s32 0, %v3306_v3  ;;  %3004 = vmatprep.mubr.msk.bf16.mxu0 %vm151_vm0, %v3096_v4  ;;  %v33_v8 = vsub.s32 2, %v3306_v3  ;;  %3010 = vmatprep.mubr.msk.bf16.mxu1 %vm151_vm0, %v3097_v5  ;;  %v40_v10 = vsub.s32 3, %v3306_v3  ;;  %v26_v16 = vsub.s32 1, %v3306_v3  ;;  %v3102_v17 = vld [vmem:[%s4254_s1 + $0x20] sm:$0xff]   ;;  %v3103_v19 = vld [vmem:[%s4254_s1 + $0x30] sm:$0xff]  }
   0x5   :  { %3014 = vmatprep.subr.bf16.mxu0 %v3100_v11  ;;  %3020 = vmatprep.subr.bf16.mxu1 %v3101_v15  ;;  %v3104_v21 = vld [vmem:[%s4254_s1 + $0x28] sm:$0xff]   ;;  %v3105_v22 = vld [vmem:[%s4254_s1 + $0x38] sm:$0xff]   ;;  %v54_v23 = vsub.s32 5, %v3306_v3  ;;  %v3106_v24 = vld [vmem:[%s4253_s0 + $0x20] sm:$0xff]   ;;  %v47_v25 = vsub.s32 4, %v3306_v3  ;;  %v68_v28 = vsub.s32 7, %v3306_v3 }
   0x6   :  { %3005 = vmatmul.mubr.msk.bf16.vlgmr.msra.gmra.mxu0 %vm151_vm0, %v3098_v7  ;;  %3011 = vmatmul.mubr.msk.bf16.vlgmr.msra.gmra.mxu1 %vm151_vm0, %v3099_v9  ;;  %v34_v13 = vrot.slane %v16_v12, %v33_v8  ;;  %v20_v14 = vrot.slane %v16_v12, %v3315_v6  ;;  %v41_v18 = vrot.slane %v16_v12, %v40_v10  ;;  %v3107_v27 = vld [vmem:[%s4253_s0 + $0x28] sm:$0xff]   ;;  %v61_v29 = vsub.s32 6, %v3306_v3  ;;  %v3108_v31 = vld [vmem:[%s4254_s1 + $0x40] sm:$0xff]   ;;  %v3109_v32 = vld [vmem:[%s4254_s1 + $0x50] sm:$0xff]  }
   0x7   :  { %3015 = vmatpush3.bf16.msra.mxu0 %v3100_v11  ;;  %v27_v20 = vrot.slane %v16_v12, %v26_v16  ;;  %3021 = vmatpush3.bf16.msra.mxu1 %v3101_v15  ;;  %v55_v26 = vrot.slane %v16_v12, %v54_v23  ;;  %v48_v30 = vrot.slane %v16_v12, %v47_v25  ;;  %v3110_v33 = vld [vmem:[%s4254_s1 + $0x48] sm:$0xff]   ;;  %v3111_v35 = vld [vmem:[%s4254_s1 + $0x58] sm:$0xff]   ;;  %v3112_v37 = vld [vmem:[%s4253_s0 + $0x30] sm:$0xff]  }
   0x8   :  { %36 = vbcast.lane.b32.xlu1 %v34_v13, 256  ;;  %22 = vbcast.lane.b32.xlu0 %v20_v14, 256  ;;  %v69_v34 = vrot.slane %v16_v12, %v68_v28  ;;  %v62_v36 = vrot.slane %v16_v12, %v61_v29  ;;  %v3113_v38 = vld [vmem:[%s4253_s0 + $0x38] sm:$0xff]   ;;  %v3114_v39 = vld [vmem:[%s4254_s1 + $0x60] sm:$0xff]   ;;  %v3115_v40 = vld [vmem:[%s4254_s1 + $0x70] sm:$0xff]  }
   0x9   :  { %3016 = vmatprep.mubr.msk.bf16.mxu0 %vm151_vm0, %v3102_v17  ;;  %3022 = vmatprep.mubr.msk.bf16.mxu1 %vm151_vm0, %v3103_v19  ;;  %v3116_v41 = vld [vmem:[%s4254_s1 + $0x68] sm:$0xff]   ;;  %v3117_v42 = vld [vmem:[%s4254_s1 + $0x78] sm:$0xff]   ;;  %s3593_s1 = smov 0  }
   0xa   :  { %3026 = vmatprep.subr.bf16.mxu0 %v3106_v24  ;;  %3032 = vmatprep.subr.bf16.mxu1 %v3107_v27 }
   0xc   :  { %43 = vbcast.lane.b32.xlu1 %v41_v18, 256  ;;  %29 = vbcast.lane.b32.xlu0 %v27_v20, 256 }
   0xe   :  { %3017 = vmatmul.mubr.msk.bf16.vlgmr.msra.gmra.mxu0 %vm151_vm0, %v3104_v21  ;;  %3023 = vmatmul.mubr.msk.bf16.vlgmr.msra.gmra.mxu1 %vm151_vm0, %v3105_v22 }
   0xf   :  { %3027 = vmatpush3.bf16.msra.mxu0 %v3106_v24  ;;  %3033 = vmatpush3.bf16.msra.mxu1 %v3107_v27 }
  0x10   :  { %57 = vbcast.lane.b32.xlu1 %v55_v26, 256  ;;  %50 = vbcast.lane.b32.xlu0 %v48_v30, 256 }
  0x11   :  { %3028 = vmatprep.mubr.msk.bf16.mxu0 %vm151_vm0, %v3108_v31  ;;  %3034 = vmatprep.mubr.msk.bf16.mxu1 %vm151_vm0, %v3109_v32 }
  0x12   :  { %3038 = vmatprep.subr.bf16.mxu0 %v3112_v37  ;;  %3044 = vmatprep.subr.bf16.mxu1 %v3113_v38 }
  0x14   :  { %71 = vbcast.lane.b32.xlu1 %v69_v34, 256  ;;  %64 = vbcast.lane.b32.xlu0 %v62_v36, 256 }
  0x16   :  { %3029 = vmatmul.mubr.msk.bf16.vlgmr.msra.gmra.mxu0 %vm151_vm0, %v3110_v33  ;;  %3035 = vmatmul.mubr.msk.bf16.vlgmr.msra.gmra.mxu1 %vm151_vm0, %v3111_v35 }
  0x17   :  { %3039 = vmatpush3.bf16.msra.mxu0 %v3112_v37  ;;  %3045 = vmatpush3.bf16.msra.mxu1 %v3113_v38 }
  0x18   :  { %3040 = vmatprep.mubr.msk.bf16.mxu0 %vm151_vm0, %v3114_v39  ;;  %3046 = vmatprep.mubr.msk.bf16.mxu1 %vm151_vm0, %v3115_v40 }
  0x1e   :  { %3041 = vmatmul.mubr.msk.bf16.vlgmr.msra.gmra.mxu0 %vm151_vm0, %v3116_v41  ;;  %3047 = vmatmul.mubr.msk.bf16.vlgmr.msra.gmra.mxu1 %vm151_vm0, %v3117_v42 }
  0x7a   :  { %v37_v43 = vpop.permute.xlu1 %36  ;;  %v23_v44 = vpop.permute.xlu0 %22 }
  0x7b   :  { %75 = vst [vmem:[#allocation3 + $0x8] sm:$0xf] %v37_v43  ;;  %73 = vst [vmem:[#allocation3] sm:$0xf] %v23_v44 }
  0x7e   :  { %v44_v45 = vpop.permute.xlu1 %43  ;;  %v30_v46 = vpop.permute.xlu0 %29 }
  0x7f   :  { %76 = vst [vmem:[#allocation3 + $0xc] sm:$0xf] %v44_v45  ;;  %74 = vst [vmem:[#allocation3 + $0x4] sm:$0xf] %v30_v46 }
  0x82   :  { %v773_v47 = vld [vmem:[#allocation3 + $0x8] sm:$0xf]  ;;  %v58_v48 = vpop.permute.xlu1 %57  ;;  %v771_v50 = vld [vmem:[#allocation3] sm:$0xf]  ;;  %v51_v51 = vpop.permute.xlu0 %50 }
  0x83   :  { %v794_v49 = vsel %vm779_vm1, %v773_v47, -inf  ;;  %78 = vst [vmem:[#allocation3 + $0x14] sm:$0xf] %v58_v48  ;;  %v780_v53 = vsel %vm779_vm1, %v771_v50, -inf  ;;  %77 = vst [vmem:[#allocation3 + $0x10] sm:$0xf] %v51_v51 }
  0x84   :  { %v795_v52 = vrot.slane %v794_v49, 4  ;;  %v781_v54 = vrot.slane %v780_v53, 4 }
  0x86   :  { %v796_v55 = vmax.f32 %v794_v49, %v795_v52  ;;  %v774_v56 = vld [vmem:[#allocation3 + $0xc] sm:$0xf]  ;;  %v72_v57 = vpop.permute.xlu1 %71  ;;  %v782_v58 = vmax.f32 %v780_v53, %v781_v54  ;;  %v772_v60 = vld [vmem:[#allocation3 + $0x4] sm:$0xf]  ;;  %v65_v61 = vpop.permute.xlu0 %64 }
  0x87   :  { %v801_v59 = vsel %vm779_vm1, %v774_v56, -inf  ;;  %80 = vst [vmem:[#allocation3 + $0x1c] sm:$0xf] %v72_v57  ;;  %v787_v0 = vsel %vm779_vm1, %v772_v60, -inf  ;;  %79 = vst [vmem:[#allocation3 + $0x18] sm:$0xf] %v65_v61 }
  0x88   :  { %v797_v62 = vrot.slane %v796_v55, 2  ;;  %v802_v63 = vrot.slane %v801_v59, 4  ;;  %v783_v1 = vrot.slane %v782_v58, 2  ;;  %v788_v2 = vrot.slane %v787_v0, 4 }
  0x8a   :  { %v798_v4 = vmax.f32 %v796_v55, %v797_v62  ;;  %v803_v5 = vmax.f32 %v801_v59, %v802_v63  ;;  %v776_v7 = vld [vmem:[#allocation3 + $0x14] sm:$0xf]  ;;  %v784_v8 = vmax.f32 %v782_v58, %v783_v1  ;;  %v789_v9 = vmax.f32 %v787_v0, %v788_v2  ;;  %v775_v11 = vld [vmem:[#allocation3 + $0x10] sm:$0xf] }
  0x8b   :  { %v815_v10 = vsel %vm779_vm1, %v776_v7, -inf  ;;  %v808_v15 = vsel %vm779_vm1, %v775_v11, -inf }
  0x8c   :  { %v799_v12 = vrot.slane %v798_v4, 1  ;;  %v804_v13 = vrot.slane %v803_v5, 2  ;;  %v816_v14 = vrot.slane %v815_v10, 4  ;;  %v785_v16 = vrot.slane %v784_v8, 1 }
  0x8d   :  { %v790_v17 = vrot.slane %v789_v9, 2  ;;  %v809_v18 = vrot.slane %v808_v15, 4 }
  0x8e   :  { %v800_v19 = vmax.f32 %v798_v4, %v799_v12  ;;  %v805_v20 = vmax.f32 %v803_v5, %v804_v13  ;;  %v817_v21 = vmax.f32 %v815_v10, %v816_v14  ;;  %v778_v22 = vld [vmem:[#allocation3 + $0x1c] sm:$0xf]  ;;  %v786_v23 = vmax.f32 %v784_v8, %v785_v16  ;;  %v777_v27 = vld [vmem:[#allocation3 + $0x18] sm:$0xf] }
  0x8f   :  { %v791_v24 = vmax.f32 %v789_v9, %v790_v17  ;;  %v810_v25 = vmax.f32 %v808_v15, %v809_v18  ;;  %v829_v26 = vsel %vm779_vm1, %v778_v22, -inf  ;;  %v822_v35 = vsel %vm779_vm1, %v777_v27, -inf }
  0x90   :  { %v838_v28 = vsub.f32 %v773_v47, %v800_v19  ;;  %v806_v29 = vrot.slane %v805_v20, 1  ;;  %v818_v30 = vrot.slane %v817_v21, 2  ;;  %v830_v31 = vrot.slane %v829_v26, 4 }
  0x91   :  { %v836_v32 = vsub.f32 %v771_v50, %v786_v23  ;;  %v792_v33 = vrot.slane %v791_v24, 1  ;;  %v811_v34 = vrot.slane %v810_v25, 2  ;;  %v823_v43 = vrot.slane %v822_v35, 4 }
  0x92   :  { %v848_v36 = vmul.f32 1.442695, %v838_v28  ;;  %v807_v37 = vmax.f32 %v805_v20, %v806_v29  ;;  %v819_v38 = vmax.f32 %v817_v21, %v818_v30  ;;  %v831_v39 = vmax.f32 %v829_v26, %v830_v31 }
  0x93   :  { %v844_v40 = vmul.f32 1.442695, %v836_v32  ;;  %v793_v41 = vmax.f32 %v791_v24, %v792_v33  ;;  %v812_v42 = vmax.f32 %v810_v25, %v811_v34  ;;  %v824_v49 = vmax.f32 %v822_v35, %v823_v43 }
  0x94   :  { %3118 = vpow2.f32 %v848_v36  ;;  %v839_v44 = vsub.f32 %v774_v56, %v807_v37  ;;  %v820_v45 = vrot.slane %v819_v38, 1  ;;  %v832_v46 = vrot.slane %v831_v39, 2 }
  0x95   :  { %3120 = vpow2.f32 %v844_v40  ;;  %v837_v47 = vsub.f32 %v772_v60, %v793_v41  ;;  %v813_v48 = vrot.slane %v812_v42, 1  ;;  %v825_v55 = vrot.slane %v824_v49, 2 }
  0x96   :  { %v850_v50 = vmul.f32 1.442695, %v839_v44  ;;  %v821_v51 = vmax.f32 %v819_v38, %v820_v45  ;;  %v833_v52 = vmax.f32 %v831_v39, %v832_v46 }
  0x97   :  { %v846_v53 = vmul.f32 1.442695, %v837_v47  ;;  %v814_v54 = vmax.f32 %v812_v42, %v813_v48  ;;  %v826_v61 = vmax.f32 %v824_v49, %v825_v55 }
  0x98   :  { %3122 = vpow2.f32 %v850_v50  ;;  %v841_v57 = vsub.f32 %v776_v7, %v821_v51  ;;  %v834_v58 = vrot.slane %v833_v52, 1 }
  0x99   :  { %3124 = vpow2.f32 %v846_v53  ;;  %v840_v59 = vsub.f32 %v775_v11, %v814_v54  ;;  %v827_v0 = vrot.slane %v826_v61, 1 }
  0x9a   :  { %v854_v62 = vmul.f32 1.442695, %v841_v57  ;;  %v835_v56 = vmax.f32 %v833_v52, %v834_v58  ;;  %v3276_v57 = vmov 1966171168  }
  0x9b   :  { %v852_v63 = vmul.f32 1.442695, %v840_v59  ;;  %v828_v1 = vmax.f32 %v826_v61, %v827_v0  ;;  %v1005_v58 = vunpack.c.l.s4 %v3276_v57 }
  0x9c   :  { %3126 = vpow2.f32 %v854_v62  ;;  %v843_v60 = vsub.f32 %v778_v22, %v835_v56 }
  0x9d   :  { %3128 = vpow2.f32 %v852_v63  ;;  %v842_v4 = vsub.f32 %v777_v27, %v828_v1  ;;  %v1006_v0 = vunpack.c.0.s8 %v1005_v58 }
  0x9e   :  { %v858_v2 = vmul.f32 1.442695, %v843_v60 }
  0x9f   :  { %v856_v8 = vmul.f32 1.442695, %v842_v4 }
  0xa0   :  { %3130 = vpow2.f32 %v858_v2 }
  0xa1   :  { %v3412_v5 = vpop.eup %3118  ;;  %3132 = vpow2.f32 %v856_v8  ;;  %v3445_v8 = vsub.s32 %v1006_v0, %v3306_v3 }
  0xa2   :  { %v3414_v9 = vpop.eup %3120  ;;  %v874_v7 = vsel %vm779_vm1, %v3412_v5, 0.0 }
  0xa3   :  { %v875_v10 = vrot.slane %v874_v7, 4  ;;  %v860_v11 = vsel %vm779_vm1, %v3414_v9, 0.0 }
  0xa4   :  { %v861_v12 = vrot.slane %v860_v11, 4 }
  0xa5   :  { %v3420_v13 = vpop.eup %3122  ;;  %v876_v14 = vadd.f32 %v875_v10, %v874_v7 }
  0xa6   :  { %v3422_v15 = vpop.eup %3124  ;;  %v862_v16 = vadd.f32 %v861_v12, %v860_v11  ;;  %v881_v17 = vsel %vm779_vm1, %v3420_v13, 0.0 }
  0xa7   :  { %v877_v18 = vrot.slane %v876_v14, 2  ;;  %v882_v19 = vrot.slane %v881_v17, 4  ;;  %v867_v20 = vsel %vm779_vm1, %v3422_v15, 0.0 }
  0xa8   :  { %v863_v21 = vrot.slane %v862_v16, 2  ;;  %v868_v22 = vrot.slane %v867_v20, 4 }
  0xa9   :  { %v3428_v23 = vpop.eup %3126  ;;  %v878_v24 = vadd.f32 %v877_v18, %v876_v14  ;;  %v883_v25 = vadd.f32 %v882_v19, %v881_v17 }
  0xaa   :  { %v3430_v26 = vpop.eup %3128  ;;  %v864_v27 = vadd.f32 %v863_v21, %v862_v16  ;;  %v869_v28 = vadd.f32 %v868_v22, %v867_v20  ;;  %v895_v29 = vsel %vm779_vm1, %v3428_v23, 0.0 }
  0xab   :  { %v879_v30 = vrot.slane %v878_v24, 1  ;;  %v884_v31 = vrot.slane %v883_v25, 2  ;;  %v896_v32 = vrot.slane %v895_v29, 4  ;;  %v888_v33 = vsel %vm779_vm1, %v3430_v26, 0.0 }
  0xac   :  { %v865_v34 = vrot.slane %v864_v27, 1  ;;  %v870_v35 = vrot.slane %v869_v28, 2  ;;  %v889_v36 = vrot.slane %v888_v33, 4 }
  0xad   :  { %v3436_v37 = vpop.eup %3130  ;;  %v880_v38 = vadd.f32 %v879_v30, %v878_v24  ;;  %v885_v39 = vadd.f32 %v884_v31, %v883_v25  ;;  %v897_v45 = vadd.f32 %v896_v32, %v895_v29 }
  0xae   :  { %v866_v40 = vadd.f32 %v865_v34, %v864_v27  ;;  %v871_v41 = vadd.f32 %v870_v35, %v869_v28  ;;  %v890_v42 = vadd.f32 %v889_v36, %v888_v33  ;;  %v909_v43 = vsel %vm779_vm1, %v3436_v37, 0.0  ;;  %v3440_v47 = vpop.eup %3132 }
  0xaf   :  { %3134 = vrcp.f32 %v880_v38  ;;  %v886_v44 = vrot.slane %v885_v39, 1  ;;  %v910_v46 = vrot.slane %v909_v43, 4  ;;  %v902_v52 = vsel %vm779_vm1, %v3440_v47, 0.0 }
  0xb0   :  { %3136 = vrcp.f32 %v866_v40  ;;  %v872_v48 = vrot.slane %v871_v41, 1  ;;  %v891_v49 = vrot.slane %v890_v42, 2  ;;  %v903_v55 = vrot.slane %v902_v52, 4 }
  0xb1   :  { %v887_v50 = vadd.f32 %v886_v44, %v885_v39  ;;  %v911_v51 = vadd.f32 %v910_v46, %v909_v43  ;;  %v898_v59 = vrot.slane %v897_v45, 2 }
  0xb2   :  { %v873_v53 = vadd.f32 %v872_v48, %v871_v41  ;;  %v892_v54 = vadd.f32 %v891_v49, %v890_v42  ;;  %v904_v56 = vadd.f32 %v903_v55, %v902_v52 }
  0xb3   :  { %3138 = vrcp.f32 %v887_v50  ;;  %v912_v62 = vrot.slane %v911_v51, 2  ;;  %v899_v60 = vadd.f32 %v898_v59, %v897_v45 }
  0xb4   :  { %3140 = vrcp.f32 %v873_v53  ;;  %v893_v61 = vrot.slane %v892_v54, 1  ;;  %v905_v63 = vrot.slane %v904_v56, 2 }
  0xb5   :  { %v913_v2 = vadd.f32 %v912_v62, %v911_v51  ;;  %v900_v7 = vrot.slane %v899_v60, 1 }
  0xb6   :  { %v894_v1 = vadd.f32 %v893_v61, %v892_v54  ;;  %v906_v4 = vadd.f32 %v905_v63, %v904_v56 }
  0xb7   :  { %v914_v11 = vrot.slane %v913_v2, 1  ;;  %v901_v18 = vadd.f32 %v900_v7, %v899_v60 }
  0xb8   :  { %3142 = vrcp.f32 %v894_v1  ;;  %v907_v14 = vrot.slane %v906_v4, 1 }
  0xb9   :  { %v915_v21 = vadd.f32 %v914_v11, %v913_v2  ;;  %3144 = vrcp.f32 %v901_v18 }
  0xba   :  { %v908_v3 = vadd.f32 %v907_v14, %v906_v4 }
  0xbb   :  { %3146 = vrcp.f32 %v915_v21 }
  0xbc   :  { %v3135_v10 = vpop.eup %3134  ;;  %3148 = vrcp.f32 %v908_v3 }
  0xbd   :  { %v3137_v12 = vpop.eup %3136  ;;  %v926_v16 = vmul.f32 %v3135_v10, %v3412_v5 }
  0xbe   :  { %v924_v17 = vmul.f32 %v3137_v12, %v3414_v9 }
  0xbf   :  { %v1058_v19 = vrot.slane %v926_v16, %v3445_v8 }
  0xc0   :  { %v3139_v20 = vpop.eup %3138  ;;  %v1010_v22 = vrot.slane %v924_v17, %v3445_v8 }
  0xc1   :  { %v3141_v24 = vpop.eup %3140  ;;  %v1059_v25 = vcombine.high %v1058_v19, %v1058_v19  ;;  %v3452_v27 = vrot.slane %v1058_v19, %v3445_v8  ;;  %v927_v28 = vmul.f32 %v3139_v20, %v3420_v13 }
  0xc2   :  { %v1011_v29 = vcombine.high %v1010_v22, %v1010_v22  ;;  %v3456_v5 = vrot.slane %v1010_v22, %v3445_v8  ;;  %v925_v9 = vmul.f32 %v3141_v24, %v3422_v15 }
  0xc3   :  { %v3460_v30 = vrot.slane %v1059_v25, %v3445_v8  ;;  %v1074_v31 = vcombine.high %v3452_v27, %v3452_v27  ;;  %v1082_v32 = vrot.slane %v927_v28, %v3445_v8  ;;  %v1231_v43 = vrot.slane %v3452_v27, %v3315_v6 }
  0xc4   :  { %v3466_v33 = vrot.slane %v1011_v29, %v3445_v8  ;;  %v1026_v13 = vcombine.high %v3456_v5, %v3456_v5  ;;  %v1034_v34 = vrot.slane %v925_v9, %v3445_v8  ;;  %v1199_v45 = vrot.slane %v3456_v5, %v3315_v6 }
  0xc5   :  { %v1075_v35 = vcombine.high %v3460_v30, %v3460_v30  ;;  %v1083_v36 = vcombine.high %v1082_v32, %v1082_v32  ;;  %v3474_v38 = vrot.slane %v1082_v32, %v3445_v8  ;;  %v3484_v46 = vrot.slane %v1074_v31, %v3315_v6  ;;  %v3143_v50 = vpop.eup %3142 }
  0xc6   :  { %v3006_v15 = vpop.f32.mrf.mxu0  ;;  %v3012_v39 = vpop.f32.mrf.mxu1  ;;  %v1027_v40 = vcombine.high %v3466_v33, %v3466_v33  ;;  %v1035_v41 = vcombine.high %v1034_v34, %v1034_v34  ;;  %v1042_v42 = vrot.slane %v1034_v34, %v3445_v8  ;;  %v1207_v52 = vrot.slane %v1026_v13, %v3315_v6 }
  0xc7   :  { %v3487_v48 = vrot.slane %v1083_v36, %v3445_v8  ;;  %v1098_v49 = vcombine.high %v3474_v38, %v3474_v38  ;;  %v1203_v55 = vrot.slane %v3466_v33, %v3315_v6  ;;  %v3498_v61 = vrot.slane %v1075_v35, %v3315_v6  ;;  %v3145_v13 = vpop.eup %3144 }
  0xc8   :  { %v192_v44 = vpop.f32.mrf.mxu0  ;;  %v263_v51 = vpop.f32.mrf.mxu1  ;;  %v1049_v53 = vrot.slane %v1035_v41, %v3445_v8  ;;  %v1050_v54 = vcombine.high %v1042_v42, %v1042_v42  ;;  %v1211_v58 = vrot.slane %v1027_v40, %v3315_v6  ;;  %v1215_v59 = vrot.slane %v1042_v42, %v3315_v6 }
  0xc9   :  { %v1099_v62 = vcombine.high %v3487_v48, %v3487_v48  ;;  %v3503_v60 = vrot.slane %v1098_v49, %v3315_v6  ;;  %v1235_v1 = vrot.slane %v3460_v30, %v3315_v6  ;;  %v1247_v10 = vrot.slane %v3474_v38, %v3315_v6  ;;  %v3517_v40 = vpop.eup %3146 }
  0xca   :  { %v3007_v57 = vpop.f32.mrf.mxu0  ;;  %v3013_v63 = vpop.f32.mrf.mxu1  ;;  %v1051_v0 = vcombine.high %v1049_v53, %v1049_v53  ;;  %v1223_v4 = vrot.slane %v1050_v54, %v3315_v6  ;;  %v928_v11 = vmul.f32 %v3143_v50, %v3430_v26  ;;  %v1251_v50 = vrot.slane %v3487_v48, %v3315_v6 }
  0xcb   :  { %v2654_v56 = vpack.c.bf16 %v3007_v57, %v3006_v15  ;;  %v2664_v2 = vpack.c.bf16 %v3013_v63, %v3012_v39  ;;  %v1219_v15 = vrot.slane %v1049_v53, %v3315_v6  ;;  %v1259_v49 = vrot.slane %v1099_v62, %v3315_v6 }
  0xcc   :  { %v195_v7 = vpop.f32.mrf.mxu0  ;;  %v1227_v16 = vrot.slane %v1051_v0, %v3315_v6  ;;  %v266_v18 = vpop.f32.mrf.mxu1  ;;  %v1106_v24 = vrot.slane %v928_v11, %v3445_v8 }
  0xcd   :  { %2918 = vst [vmem:[#allocation2] sm:$0xff] %v2654_v56   ;;  %v2732_v12 = vunpack.c.l.bf16 %v2654_v56  ;;  %v2733_v14 = vunpack.c.h.bf16 %v2654_v56  ;;  %v2649_v17 = vpack.c.bf16 %v195_v7, %v192_v44  ;;  %2920 = vst [vmem:[#allocation2 + $0x18] sm:$0xff] %v2664_v2   ;;  %v2740_v19 = vunpack.c.l.bf16 %v2664_v2 }
  0xce   :  { %v2741_v20 = vunpack.c.h.bf16 %v2664_v2  ;;  %v2659_v21 = vpack.c.bf16 %v266_v18, %v263_v51  ;;  %v3018_v22 = vpop.f32.mrf.mxu0  ;;  %v3024_v26 = vpop.f32.mrf.mxu1  ;;  %v1107_v36 = vcombine.high %v1106_v24, %v1106_v24  ;;  %v3515_v39 = vrot.slane %v1106_v24, %v3445_v8 }
  0xcf   :  { %v1358_v3 = vmul.f32 %v2732_v12, %v1207_v52  ;;  %v1359_v25 = vmul.f32 %v2733_v14, %v1211_v58  ;;  %2650 = vst [vmem:[#allocation2 + $0x30] sm:$0xff] %v2649_v17   ;;  %v2728_v28 = vunpack.c.l.bf16 %v2649_v17  ;;  %v2729_v29 = vunpack.c.h.bf16 %v2649_v17  ;;  %v3522_v51 = vpop.eup %3148 }
  0xd0   :  { %v1362_v5 = vmul.f32 %v2740_v19, %v1223_v4  ;;  %v1363_v9 = vmul.f32 %v2741_v20, %v1227_v16  ;;  %2919 = vst [vmem:[#allocation2 + $0x58] sm:$0xff] %v2659_v21   ;;  %v2736_v31 = vunpack.c.l.bf16 %v2659_v21  ;;  %v2737_v32 = vunpack.c.h.bf16 %v2659_v21  ;;  %v334_v33 = vpop.f32.mrf.mxu0  ;;  %v405_v35 = vpop.f32.mrf.mxu1 }
  0xd1   :  { %v1356_v34 = vmul.f32 %v2728_v28, %v1199_v45  ;;  %v1357_v41 = vmul.f32 %v2729_v29, %v1203_v55  ;;  %v3525_v57 = vrot.slane %v1107_v36, %v3445_v8  ;;  %v1122_v55 = vcombine.high %v3515_v39, %v3515_v39 }
  0xd2   :  { %v1360_v42 = vmul.f32 %v2736_v31, %v1215_v59  ;;  %v3019_v44 = vpop.f32.mrf.mxu0  ;;  %v1402_v45 = vadd.f32 %v1362_v5, %v1358_v3  ;;  %v1409_v52 = vadd.f32 %v1363_v9, %v1359_v25  ;;  %v3025_v54 = vpop.f32.mrf.mxu1  ;;  %v1361_v58 = vmul.f32 %v2737_v32, %v1219_v15 }
  0xd3   :  { %v2674_v53 = vpack.c.bf16 %v3019_v44, %v3018_v22  ;;  %v2684_v56 = vpack.c.bf16 %v3025_v54, %v3024_v26  ;;  %v929_v59 = vmul.f32 %v3145_v13, %v3428_v23  ;;  %v1123_v16 = vcombine.high %v3525_v57, %v3525_v57 }
  0xd4   :  { %v337_v63 = vpop.f32.mrf.mxu0  ;;  %v1388_v62 = vadd.f32 %v1360_v42, %v1356_v34  ;;  %v408_v4 = vpop.f32.mrf.mxu1  ;;  %v1395_v21 = vadd.f32 %v1361_v58, %v1357_v41  ;;  %v1263_v25 = vrot.slane %v3515_v39, %v3315_v6  ;;  %v1271_v32 = vrot.slane %v1122_v55, %v3315_v6 }
  0xd5   :  { %2922 = vst [vmem:[#allocation2 + $0x68] sm:$0xff] %v2674_v53   ;;  %v2748_v48 = vunpack.c.l.bf16 %v2674_v53  ;;  %v2749_v0 = vunpack.c.h.bf16 %v2674_v53  ;;  %v2669_v2 = vpack.c.bf16 %v337_v63, %v334_v33  ;;  %2924 = vst [vmem:[#allocation2 + $0x48] sm:$0xff] %v2684_v56   ;;  %v2756_v7 = vunpack.c.l.bf16 %v2684_v56 }
  0xd6   :  { %v2757_v11 = vunpack.c.h.bf16 %v2684_v56  ;;  %v2679_v12 = vpack.c.bf16 %v408_v4, %v405_v35  ;;  %v3030_v14 = vpop.f32.mrf.mxu0  ;;  %v3036_v20 = vpop.f32.mrf.mxu1  ;;  %v1130_v33 = vrot.slane %v929_v59, %v3445_v8 }
  0xd7   :  { %v1366_v17 = vmul.f32 %v2748_v48, %v3484_v46  ;;  %v1367_v18 = vmul.f32 %v2749_v0, %v3498_v61  ;;  %2921 = vst [vmem:[#allocation2 + $0x50] sm:$0xff] %v2669_v2   ;;  %v2744_v23 = vunpack.c.l.bf16 %v2669_v2  ;;  %v2745_v19 = vunpack.c.h.bf16 %v2669_v2 }
  0xd8   :  { %2923 = vst [vmem:[#allocation2 + $0x8] sm:$0xff] %v2679_v12   ;;  %v2752_v22 = vunpack.c.l.bf16 %v2679_v12  ;;  %v2753_v24 = vunpack.c.h.bf16 %v2679_v12  ;;  %v476_v3 = vpop.f32.mrf.mxu0  ;;  %v547_v26 = vpop.f32.mrf.mxu1  ;;  %v1370_v5 = vmul.f32 %v2756_v7, %v3503_v60  ;;  %v1371_v9 = vmul.f32 %v2757_v11, %v1259_v49 }
  0xd9   :  { %v1403_v28 = vadd.f32 %v1402_v45, %v1366_v17  ;;  %v1410_v29 = vadd.f32 %v1409_v52, %v1367_v18  ;;  %v1364_v46 = vmul.f32 %v2744_v23, %v1231_v43  ;;  %v1365_v61 = vmul.f32 %v2745_v19, %v1235_v1 }
  0xda   :  { %v3031_v31 = vpop.f32.mrf.mxu0  ;;  %v1368_v34 = vmul.f32 %v2752_v22, %v1247_v10  ;;  %v1369_v27 = vmul.f32 %v2753_v24, %v1251_v50  ;;  %v1275_v43 = vrot.slane %v1123_v16, %v3315_v6  ;;  %v3037_v15 = vpop.f32.mrf.mxu1  ;;  %v1131_v35 = vcombine.high %v1130_v33, %v1130_v33 }
  0xdb   :  { %v1389_v13 = vadd.f32 %v1388_v62, %v1364_v46  ;;  %v2694_v30 = vpack.c.bf16 %v3031_v31, %v3030_v14  ;;  %v2704_v1 = vpack.c.bf16 %v3037_v15, %v3036_v20  ;;  %v1138_v60 = vrot.slane %v1130_v33, %v3445_v8 }
  0xdc   :  { %v479_v36 = vpop.f32.mrf.mxu0  ;;  %v1404_v39 = vadd.f32 %v1403_v28, %v1370_v5  ;;  %v1411_v41 = vadd.f32 %v1410_v29, %v1371_v9  ;;  %v1396_v42 = vadd.f32 %v1395_v21, %v1365_v61  ;;  %v550_v49 = vpop.f32.mrf.mxu1  ;;  %v1267_v10 = vrot.slane %v3525_v57, %v3315_v6 }
  0xdd   :  { %v2689_v44 = vpack.c.bf16 %v479_v36, %v476_v3  ;;  %v1390_v45 = vadd.f32 %v1389_v13, %v1368_v34  ;;  %2926 = vst [vmem:[#allocation2 + $0x20] sm:$0xff] %v2694_v30   ;;  %v2764_v52 = vunpack.c.l.bf16 %v2694_v30  ;;  %v2765_v38 = vunpack.c.h.bf16 %v2694_v30  ;;  %2928 = vst [vmem:[#allocation2 + $0x38] sm:$0xff] %v2704_v1  }
  0xde   :  { %v3042_v50 = vpop.f32.mrf.mxu0  ;;  %v1145_v53 = vrot.slane %v1131_v35, %v3445_v8  ;;  %v1146_v54 = vcombine.high %v1138_v60, %v1138_v60  ;;  %v3048_v63 = vpop.f32.mrf.mxu1  ;;  %v2772_v59 = vunpack.c.l.bf16 %v2704_v1  ;;  %v2773_v62 = vunpack.c.h.bf16 %v2704_v1 }
  0xdf   :  { %2925 = vst [vmem:[#allocation2 + $0x40] sm:$0xff] %v2689_v44   ;;  %v2760_v58 = vunpack.c.l.bf16 %v2689_v44  ;;  %v2761_v56 = vunpack.c.h.bf16 %v2689_v44  ;;  %v1374_v55 = vmul.f32 %v2764_v52, %v1271_v32  ;;  %v2699_v48 = vpack.c.bf16 %v550_v49, %v547_v26 }
  0xe0   :  { %v618_v0 = vpop.f32.mrf.mxu0  ;;  %v1375_v2 = vmul.f32 %v2765_v38, %v1275_v43  ;;  %v1147_v4 = vcombine.high %v1145_v53, %v1145_v53  ;;  %v689_v12 = vpop.f32.mrf.mxu1  ;;  %v1287_v57 = vrot.slane %v1146_v54, %v3315_v6  ;;  %v1397_v23 = vadd.f32 %v1396_v42, %v1369_v27 }
  0xe1   :  { %v1372_v7 = vmul.f32 %v2760_v58, %v1263_v25  ;;  %v1373_v11 = vmul.f32 %v2761_v56, %v1267_v10  ;;  %v1405_v14 = vadd.f32 %v1404_v39, %v1374_v55  ;;  %2927 = vst [vmem:[#allocation2 + $0x10] sm:$0xff] %v2699_v48   ;;  %v2768_v16 = vunpack.c.l.bf16 %v2699_v48 }
  0xe2   :  { %v2769_v17 = vunpack.c.h.bf16 %v2699_v48  ;;  %v3043_v18 = vpop.f32.mrf.mxu0  ;;  %v1291_v19 = vrot.slane %v1147_v4, %v3315_v6  ;;  %v1279_v21 = vrot.slane %v1138_v60, %v3315_v6  ;;  %v3049_v22 = vpop.f32.mrf.mxu1  ;;  %v1378_v24 = vmul.f32 %v2772_v59, %v1287_v57 }
  0xe3   :  { %v1391_v20 = vadd.f32 %v1390_v45, %v1372_v7  ;;  %v1283_v3 = vrot.slane %v1145_v53, %v3315_v6  ;;  %v2714_v25 = vpack.c.bf16 %v3043_v18, %v3042_v50  ;;  %v930_v28 = vmul.f32 %v3522_v51, %v3440_v47 }
  0xe4   :  { %v1398_v29 = vadd.f32 %v1397_v23, %v1373_v11  ;;  %v1376_v46 = vmul.f32 %v2768_v16, %v1279_v21  ;;  %v2724_v61 = vpack.c.bf16 %v3049_v22, %v3048_v63  ;;  %v931_v26 = vmul.f32 %v3517_v40, %v3436_v37  ;;  %v621_v5 = vpop.f32.mrf.mxu0  ;;  %v692_v9 = vpop.f32.mrf.mxu1 }
  0xe5   :  { %v1412_v31 = vadd.f32 %v1411_v41, %v1375_v2  ;;  %v1379_v32 = vmul.f32 %v2773_v62, %v1291_v19  ;;  %v1406_v33 = vadd.f32 %v1405_v14, %v1378_v24  ;;  %v1377_v13 = vmul.f32 %v2769_v17, %v1283_v3  ;;  %2930 = vst [vmem:[#allocation2 + $0x70] sm:$0xff] %v2714_v25  }
  0xe6   :  { %v1392_v34 = vadd.f32 %v1391_v20, %v1376_v46  ;;  %v2780_v27 = vunpack.c.l.bf16 %v2714_v25  ;;  %v2781_v43 = vunpack.c.h.bf16 %v2714_v25  ;;  %v1154_v15 = vrot.slane %v930_v28, %v3445_v8  ;;  %2932 = vst [vmem:[#allocation2 + $0x28] sm:$0xff] %v2724_v61  }
  0xe7   :  { %v2788_v47 = vunpack.c.l.bf16 %v2724_v61  ;;  %v1178_v51 = vrot.slane %v931_v26, %v3445_v8  ;;  %v2709_v30 = vpack.c.bf16 %v621_v5, %v618_v0  ;;  %v2719_v1 = vpack.c.bf16 %v692_v9, %v689_v12 }
  0xe8   :  { %v1399_v35 = vadd.f32 %v1398_v29, %v1377_v13  ;;  %v1155_v37 = vcombine.high %v1154_v15, %v1154_v15  ;;  %v1162_v40 = vrot.slane %v1154_v15, %v3445_v8  ;;  %v2789_v60 = vunpack.c.h.bf16 %v2724_v61 }
  0xe9   :  { %v1179_v36 = vcombine.high %v1178_v51, %v1178_v51  ;;  %v1186_v39 = vrot.slane %v1178_v51, %v3445_v8  ;;  %2929 = vst [vmem:[#allocation2 + $0x60] sm:$0xff] %v2709_v30   ;;  %v2776_v41 = vunpack.c.l.bf16 %v2709_v30  ;;  %v2777_v42 = vunpack.c.h.bf16 %v2709_v30  ;;  %2931 = vst [vmem:[#allocation2 + $0x78] sm:$0xff] %v2719_v1  }
  0xea   :  { %v1169_v44 = vrot.slane %v1155_v37, %v3445_v8  ;;  %v1170_v49 = vcombine.high %v1162_v40, %v1162_v40  ;;  %v1295_v45 = vrot.slane %v1162_v40, %v3315_v6  ;;  %v2784_v52 = vunpack.c.l.bf16 %v2719_v1 }
  0xeb   :  { %v1193_v38 = vrot.slane %v1179_v36, %v3445_v8  ;;  %v1194_v10 = vcombine.high %v1186_v39, %v1186_v39  ;;  %v2785_v50 = vunpack.c.h.bf16 %v2719_v1  ;;  %v1311_v53 = vrot.slane %v1186_v39, %v3315_v6 }
  0xec   :  { %v1171_v54 = vcombine.high %v1169_v44, %v1169_v44  ;;  %v1303_v58 = vrot.slane %v1170_v49, %v3315_v6  ;;  %v1299_v56 = vrot.slane %v1169_v44, %v3315_v6  ;;  %v1380_v63 = vmul.f32 %v2776_v41, %v1295_v45 }
  0xed   :  { %v1195_v55 = vcombine.high %v1193_v38, %v1193_v38  ;;  %v1319_v59 = vrot.slane %v1194_v10, %v3315_v6  ;;  %v1315_v62 = vrot.slane %v1193_v38, %v3315_v6  ;;  %v1384_v48 = vmul.f32 %v2784_v52, %v1311_v53 }
  0xee   :  { %v1307_v0 = vrot.slane %v1171_v54, %v3315_v6  ;;  %v1382_v2 = vmul.f32 %v2780_v27, %v1303_v58  ;;  %v1381_v4 = vmul.f32 %v2777_v42, %v1299_v56  ;;  %v1393_v7 = vadd.f32 %v1392_v34, %v1380_v63 }
  0xef   :  { %v1413_v11 = vadd.f32 %v1412_v31, %v1379_v32  ;;  %v1323_v12 = vrot.slane %v1195_v55, %v3315_v6  ;;  %v1386_v14 = vmul.f32 %v2788_v47, %v1319_v59  ;;  %v1385_v57 = vmul.f32 %v2785_v50, %v1315_v62 }
  0xf0   :  { %v1383_v16 = vmul.f32 %v2781_v43, %v1307_v0  ;;  %v1407_v17 = vadd.f32 %v1406_v33, %v1382_v2  ;;  %v1400_v18 = vadd.f32 %v1399_v35, %v1381_v4  ;;  %v3575_v23 = vadd.f32 %v1393_v7, %v1384_v48 }
  0xf1   :  { %v1387_v19 = vmul.f32 %v2789_v60, %v1323_v12 }
  0xf2   :  { %v1414_v20 = vadd.f32 %v1413_v11, %v1383_v16  ;;  %v1408_v21 = vadd.f32 %v1407_v17, %v1386_v14  ;;  %v3577_v22 = vadd.f32 %v1400_v18, %v1385_v57  ;;  %v1420_v24 = vmul.f32 %v3575_v23, %v3575_v23 }
  0xf4   :  { %v1415_v3 = vadd.f32 %v1414_v20, %v1387_v19  ;;  %v1422_v25 = vmul.f32 %v1408_v21, %v1408_v21  ;;  %v1421_v28 = vmul.f32 %v3577_v22, %v3577_v22  ;;  %v1424_v29 = vrot.slane %v1420_v24, 4 }
  0xf6   :  { %v1423_v46 = vmul.f32 %v1415_v3, %v1415_v3  ;;  %v1436_v61 = vrot.slane %v1422_v25, 4  ;;  %v1425_v26 = vadd.f32 %v1424_v29, %v1420_v24  ;;  %v1430_v5 = vrot.slane %v1421_v28, 4 }
  0xf8   :  { %v1437_v9 = vadd.f32 %v1436_v61, %v1422_v25  ;;  %v1442_v31 = vrot.slane %v1423_v46, 4  ;;  %v1426_v32 = vrot.slane %v1425_v26, 2  ;;  %v1431_v33 = vadd.f32 %v1430_v5, %v1421_v28 }
  0xfa   :  { %v1438_v13 = vrot.slane %v1437_v9, 2  ;;  %v1443_v34 = vadd.f32 %v1442_v31, %v1423_v46  ;;  %v1427_v27 = vadd.f32 %v1426_v32, %v1425_v26  ;;  %v1432_v43 = vrot.slane %v1431_v33, 2 }
  0xfc   :  { %v1439_v15 = vadd.f32 %v1438_v13, %v1437_v9  ;;  %v1444_v47 = vrot.slane %v1443_v34, 2  ;;  %v1428_v51 = vrot.slane %v1427_v27, 1  ;;  %v1433_v30 = vadd.f32 %v1432_v43, %v1431_v33 }
  0xfe   :  { %v1440_v1 = vrot.slane %v1439_v15, 1  ;;  %v1445_v35 = vadd.f32 %v1444_v47, %v1443_v34  ;;  %v1429_v37 = vadd.f32 %v1428_v51, %v1427_v27  ;;  %v1434_v40 = vrot.slane %v1433_v30, 1 }
 0x100   :  { %v1441_v60 = vadd.f32 %v1440_v1, %v1439_v15  ;;  %v1446_v36 = vrot.slane %v1445_v35, 1  ;;  %v1435_v39 = vadd.f32 %v1434_v40, %v1433_v30  ;;  %v1448_v41 = vadd.f32 1.0, %v1429_v37 }
 0x101   :  { %v1460_v10 = vadd.f32 1e-09, %v1429_v37 }
 0x102   :  { %v1447_v42 = vadd.f32 %v1446_v36, %v1445_v35  ;;  %v1450_v44 = vadd.f32 1.0, %v1441_v60  ;;  %v1462_v49 = vadd.f32 1e-09, %v1441_v60  ;;  %3150 = vrcp.f32 %v1448_v41 }
 0x103   :  { %v1449_v38 = vadd.f32 1.0, %v1435_v39  ;;  %v1461_v50 = vadd.f32 1e-09, %v1435_v39 }
 0x104   :  { %v1451_v45 = vadd.f32 1.0, %v1447_v42  ;;  %3152 = vrcp.f32 %v1450_v44  ;;  %v1463_v52 = vadd.f32 1e-09, %v1447_v42 }
 0x105   :  { %3154 = vrsqrt.f32 %v1462_v49 }
 0x106   :  { %3156 = vrcp.f32 %v1451_v45 }
 0x107   :  { %3158 = vrsqrt.f32 %v1463_v52 }
 0x108   :  { %3160 = vrcp.f32 %v1449_v38 }
 0x109   :  { %3162 = vrsqrt.f32 %v1460_v10 }
 0x10a   :  { %3164 = vrsqrt.f32 %v1461_v50 }
 0x10f   :  { %v3151_v53 = vpop.eup %3150 }
 0x110   :  { %v1453_v55 = vmul.f32 %v3151_v53, %v1429_v37 }
 0x111   :  { %v3153_v54 = vpop.eup %3152 }
 0x112   :  { %v3155_v58 = vpop.eup %3154  ;;  %v1457_v56 = vmul.f32 %v3153_v54, %v1441_v60 }
 0x113   :  { %v3157_v63 = vpop.eup %3156 }
 0x114   :  { %v3159_v59 = vpop.eup %3158  ;;  %v1459_v62 = vmul.f32 %v3157_v63, %v1447_v42  ;;  %v1470_v48 = vmul.f32 %v3155_v58, %v1457_v56 }
 0x115   :  { %v3161_v0 = vpop.eup %3160 }
 0x116   :  { %v3163_v2 = vpop.eup %3162  ;;  %v1471_v4 = vmul.f32 %v3159_v59, %v1459_v62  ;;  %v1474_v7 = vmul.f32 %v1470_v48, %v1408_v21   ;;  %v1455_v11 = vmul.f32 %v3161_v0, %v1435_v39 }
 0x117   :  { %v3165_v12 = vpop.eup %3164  ;;  %v1468_v14 = vmul.f32 %v3163_v2, %v1453_v55 }
 0x118   :  { %v1475_v57 = vmul.f32 %v1471_v4, %v1415_v3   ;;  %v1469_v16 = vmul.f32 %v3165_v12, %v1455_v11 }
 0x119   :  { %v1472_v17 = vmul.f32 %v1468_v14, %v3575_v23  }
 0x11a   :  { %v1473_v18 = vmul.f32 %v1469_v16, %v3577_v22  }
 0x11b LB: > { %v3610_v23 = vld [vmem:[#allocation2 + $0x30] sm:$0xff]   ;;  %v3612_v19 = vld [vmem:[#allocation2] sm:$0xff]   ;;  %v3614_v20 = vld [vmem:[#allocation2 + $0x58] sm:$0xff]   ;;  %vm1814_vm2 = vcmask 1041409   ;;  %vm1816_vm3 = vcmask 1042434   ;;  %vm1818_vm4 = vcmask 1043459   ;;  %s3274_s1 = sphi %s3593_s1, %s1481_s1   ;;  %v3270_v17 = vphi %v1472_v17, %v4384_v17   ;;  %v3266_v18 = vphi %v1473_v18, %v4383_v18   ;;  %v3262_v7 = vphi %v1474_v7, %v4382_v7   ;;  %v3258_v57 = vphi %v1475_v57, %v4381_v57  }
 0x11c   : > { %4318 = vst [vmem:[#allocation7_spill] sm:$0xff] %v3612_v19  ;;  %4319 = vst [vmem:[#allocation8_spill] sm:$0xff] %v3614_v20  ;;  %v3616_v21 = vld [vmem:[#allocation2 + $0x18] sm:$0xff]   ;;  %v3618_v22 = vld [vmem:[#allocation2 + $0x50] sm:$0xff]   ;;  %v4284_v3 = vunpack.c.l.bf16 %v3610_v23  ;;  %v4283_v25 = vunpack.c.h.bf16 %v3610_v23  ;;  %v4279_v28 = vunpack.c.l.bf16 %v3612_v19  ;;  %v4257_v61 = vunpack.c.h.bf16 %v3612_v19  ;;  %s1481_s1 = sadd.s32 1, %s3274_s1  }
 0x11d   : > { %4320 = vst [vmem:[#allocation9_spill] sm:$0xff] %v3616_v21  ;;  %4321 = vst [vmem:[#allocation10_spill] sm:$0xff] %v3618_v22  ;;  %v3620_v24 = vld [vmem:[#allocation2 + $0x68] sm:$0xff]   ;;  %v4282_v26 = vunpack.c.l.bf16 %v3614_v20  ;;  %v4280_v5 = vunpack.c.h.bf16 %v3614_v20  ;;  %v4258_v9 = vunpack.c.l.bf16 %v3616_v21  ;;  %v3633_v31 = vld [vmem:[#allocation2 + $0x40] sm:$0xff]   ;;  %v4278_v33 = vunpack.c.h.bf16 %v3616_v21  ;;  %p1478_p0 = scmp.ge.s32.totalorder %s1481_s1, 3  }
 0x11e   : > { %4322 = vst [vmem:[#allocation11_spill] sm:$0xff] %v3620_v24  ;;  %v3625_v29 = vld [vmem:[#allocation2 + $0x8] sm:$0xff]   ;;  %4325 = vst [vmem:[#allocation14_spill] sm:$0xff] %v3633_v31  ;;  %v3635_v32 = vld [vmem:[#allocation2 + $0x20] sm:$0xff]   ;;  %v4259_v13 = vunpack.c.l.bf16 %v3618_v22  ;;  %v4260_v34 = vunpack.c.h.bf16 %v3618_v22  ;;  %v4261_v27 = vunpack.c.l.bf16 %v3620_v24  ;;  %v4262_v47 = vunpack.c.h.bf16 %v3620_v24  ;;  %s3277_s5 = smov (%p1478_p0), [#allocation4]  }
 0x11f   : > { %4323 = vst [vmem:[#allocation12_spill] sm:$0xff] %v3625_v29  ;;  %v3627_v46 = vld [vmem:[#allocation2 + $0x48] sm:$0xff]   ;;  %4326 = vst [vmem:[#allocation15_spill] sm:$0xff] %v3635_v32  ;;  %v3641_v43 = vld [vmem:[#allocation2 + $0x10] sm:$0xff]   ;;  %v4263_v51 = vunpack.c.l.bf16 %v3625_v29  ;;  %v4264_v30 = vunpack.c.h.bf16 %v3625_v29  ;;  %v4267_v60 = vunpack.c.l.bf16 %v3633_v31  ;;  %v4268_v36 = vunpack.c.h.bf16 %v3633_v31  ;;  %s2578_s6 = sshll.u32 (%p1478_p0), %s3277_s5, 4  ;;  %s2579_s6 = int_to_ptr.vmem [resolvable:$true] %s2578_s6 }
 0x120   : > { %4324 = vst [vmem:[#allocation13_spill] sm:$0xff] %v3627_v46  ;;  %4327 = vst [vmem:[#allocation16_spill] sm:$0xff] %v3641_v43  ;;  %v3643_v15 = vld [vmem:[#allocation2 + $0x38] sm:$0xff]   ;;  %v4265_v1 = vunpack.c.l.bf16 %v3627_v46  ;;  %v3649_v35 = vld [vmem:[#allocation2 + $0x60] sm:$0xff]   ;;  %v4266_v40 = vunpack.c.h.bf16 %v3627_v46  ;;  %v4269_v39 = vunpack.c.l.bf16 %v3635_v32  ;;  %v4270_v44 = vunpack.c.h.bf16 %v3635_v32  ;;  %s3214_s7 = scalar_lea.vmem (%p1478_p0), %s2579_s6, 512  ;;  %p3219_p2 = scmp.lt.s32.totalorder (%p1478_p0), %s2579_s6, %s2579_s6 }
 0x121   : > { %4328 = vst [vmem:[#allocation17_spill] sm:$0xff] %v3643_v15  ;;  %4329 = vst [vmem:[#allocation18_spill] sm:$0xff] %v3649_v35  ;;  %v3651_v37 = vld [vmem:[#allocation2 + $0x70] sm:$0xff]   ;;  %v3657_v41 = vld [vmem:[#allocation2 + $0x78] sm:$0xff]   ;;  %v4271_v49 = vunpack.c.l.bf16 %v3641_v43  ;;  %v4272_v45 = vunpack.c.h.bf16 %v3641_v43  ;;  %v4273_v52 = vunpack.c.l.bf16 %v3643_v15  ;;  %v4274_v38 = vunpack.c.h.bf16 %v3643_v15  ;;  %p3215_p1 = scmp.ne.s32.totalorder (%p1478_p0), %s2579_s6, %s3214_s7  ;;  %p3220_p3 = scmp.lt.s32.totalorder (%p1478_p0), %s3214_s7, %s3214_s7 }
 0x122   : > { %4330 = vst [vmem:[#allocation19_spill] sm:$0xff] %v3651_v37  ;;  %4331 = vst [vmem:[#allocation20_spill] sm:$0xff] %v3657_v41  ;;  %v3659_v42 = vld [vmem:[#allocation2 + $0x28] sm:$0xff]   ;;  %v4275_v10 = vunpack.c.l.bf16 %v3649_v35  ;;  %v4276_v50 = vunpack.c.h.bf16 %v3649_v35  ;;  %v4277_v53 = vunpack.c.l.bf16 %v3651_v37  ;;  %v4281_v54 = vunpack.c.h.bf16 %v3651_v37 }
 0x123   : > { %4332 = vst [vmem:[#allocation21_spill] sm:$0xff] %v3659_v42  ;;  %v4285_v58 = vunpack.c.l.bf16 %v3657_v41  ;;  %v4292_v56 = vunpack.c.h.bf16 %v3657_v41  ;;  %v4299_v63 = vunpack.c.l.bf16 %v3659_v42  ;;  %v1550_v59 = vmul.f32 %v3270_v17, %v4284_v3  ;;  %p3221_p4 = por (%p1478_p0), %p3220_p3, %p3219_p2 }
 0x124   : > { %v1551_v62 = vmul.f32 %v3266_v18, %v4283_v25  ;;  %v1552_v48 = vmul.f32 %v3262_v7, %v4279_v28  ;;  %v1553_v0 = vmul.f32 %v3258_v57, %v4257_v61  ;;  %v1554_v2 = vmul.f32 %v3270_v17, %v4282_v26 }
 0x125   : > { %v1555_v4 = vmul.f32 %v3266_v18, %v4280_v5  ;;  %v1556_v11 = vmul.f32 %v3262_v7, %v4258_v9  ;;  %v1557_v12 = vmul.f32 %v3258_v57, %v4278_v33  ;;  %v3701_v14 = vmul.f32 %v3270_v17, %v4259_v13  ;;  %p3222_p5 = pnand (%p1478_p0), %p3221_p4, %p3215_p1 }
 0x126   : > { %v3706_v16 = vmul.f32 %v3266_v18, %v4260_v34  ;;  %v3711_v61 = vmul.f32 %v3262_v7, %v4261_v27  ;;  %v3716_v9 = vmul.f32 %v3258_v57, %v4262_v47  ;;  %v3721_v13 = vmul.f32 %v3270_v17, %v4263_v51 }
 0x127   : > { %v3726_v34 = vmul.f32 %v3266_v18, %v4264_v30  ;;  %v3731_v27 = vmul.f32 %v3262_v7, %v4265_v1  ;;  %v3736_v47 = vmul.f32 %v3258_v57, %v4266_v40  ;;  %v3741_v51 = vmul.f32 %v3270_v17, %v4267_v60 }
 0x128   : > { %v3746_v30 = vmul.f32 %v3266_v18, %v4268_v36  ;;  %v3751_v1 = vmul.f32 %v3262_v7, %v4269_v39  ;;  %v3756_v40 = vmul.f32 %v3258_v57, %v4270_v44  ;;  %v3761_v60 = vmul.f32 %v3270_v17, %v4271_v49 }
 0x129   : > { %v3766_v36 = vmul.f32 %v3266_v18, %v4272_v45  ;;  %v3771_v39 = vmul.f32 %v3262_v7, %v4273_v52  ;;  %v3776_v44 = vmul.f32 %v3258_v57, %v4274_v38  ;;  %v3781_v49 = vmul.f32 %v3270_v17, %v4275_v10 }
 0x12a   : > { %v3786_v45 = vmul.f32 %v3266_v18, %v4276_v50  ;;  %v3791_v52 = vmul.f32 %v3262_v7, %v4277_v53  ;;  %v3796_v38 = vmul.f32 %v3258_v57, %v4281_v54  ;;  %v3801_v10 = vmul.f32 %v3270_v17, %v4285_v58 }
 0x12b   : > { %v3806_v50 = vmul.f32 %v3266_v18, %v4292_v56  ;;  %v3811_v53 = vmul.f32 %v3262_v7, %v4299_v63  ;;  %v1582_v33 = vrot.slane %v1550_v59, 4  ;;  %v1588_v28 = vrot.slane %v1551_v62, 4 }
 0x12c   : > { %v1594_v5 = vrot.slane %v1552_v48, 4  ;;  %v1600_v54 = vrot.slane %v1553_v0, 4  ;;  %v1606_v26 = vrot.slane %v1554_v2, 4  ;;  %v1612_v25 = vrot.slane %v1555_v4, 4 }
 0x12d   : > { %v1618_v3 = vrot.slane %v1556_v11, 4  ;;  %v1624_v55 = vrot.slane %v1557_v12, 4  ;;  %v1583_v17 = vadd.f32 %v1582_v33, %v1550_v59  ;;  %v1589_v58 = vadd.f32 %v1588_v28, %v1551_v62 }
 0x12e   : > { %v1595_v37 = vadd.f32 %v1594_v5, %v1552_v48  ;;  %v1601_v41 = vadd.f32 %v1600_v54, %v1553_v0  ;;  %v1607_v35 = vadd.f32 %v1606_v26, %v1554_v2  ;;  %v1613_v18 = vadd.f32 %v1612_v25, %v1555_v4 }
 0x12f   : > { %v1619_v56 = vadd.f32 %v1618_v3, %v1556_v11  ;;  %v1625_v15 = vadd.f32 %v1624_v55, %v1557_v12  ;;  %v1584_v43 = vrot.slane %v1583_v17, 2  ;;  %v1590_v32 = vrot.slane %v1589_v58, 2 }
 0x130   : > { %v1596_v7 = vrot.slane %v1595_v37, 2  ;;  %v1602_v63 = vrot.slane %v1601_v41, 2  ;;  %v1608_v31 = vrot.slane %v1607_v35, 2  ;;  %v1614_v46 = vrot.slane %v1613_v18, 2 }
 0x131   : > { %v1620_v29 = vrot.slane %v1619_v56, 2  ;;  %v1626_v24 = vrot.slane %v1625_v15, 2  ;;  %v1585_v22 = vadd.f32 %v1584_v43, %v1583_v17  ;;  %v1591_v21 = vadd.f32 %v1590_v32, %v1589_v58 }
 0x132   : > { %v1597_v19 = vadd.f32 %v1596_v7, %v1595_v37  ;;  %v1603_v20 = vadd.f32 %v1602_v63, %v1601_v41  ;;  %v1609_v33 = vadd.f32 %v1608_v31, %v1607_v35  ;;  %v1615_v28 = vadd.f32 %v1614_v46, %v1613_v18 }
 0x133   : > { %v1621_v5 = vadd.f32 %v1620_v29, %v1619_v56  ;;  %v1627_v54 = vadd.f32 %v1626_v24, %v1625_v15  ;;  %v1586_v26 = vrot.slane %v1585_v22, 1  ;;  %v1592_v25 = vrot.slane %v1591_v21, 1 }
 0x134   : > { %v1598_v3 = vrot.slane %v1597_v19, 1  ;;  %v1604_v55 = vrot.slane %v1603_v20, 1  ;;  %v4333_v59 = vunpack.c.h.bf16 %v3659_v42  ;;  %v1610_v48 = vrot.slane %v1609_v33, 1 }
 0x135   : > { %v1616_v0 = vrot.slane %v1615_v28, 1  ;;  %v1622_v2 = vrot.slane %v1621_v5, 1  ;;  %v3818_v43 = vadd.f32 %v1586_v26, %v1585_v22  ;;  %v3820_v32 = vadd.f32 %v1592_v25, %v1591_v21 }
 0x136   : > { %v3816_v62 = vmul.f32 %v3258_v57, %v4333_v59  ;;  %v3822_v31 = vadd.f32 %v1598_v3, %v1597_v19  ;;  %v1628_v29 = vrot.slane %v1627_v54, 1  ;;  %v3824_v24 = vadd.f32 %v1604_v55, %v1603_v20 }
 0x137   : > { %v3826_v46 = vadd.f32 %v1610_v48, %v1609_v33  ;;  %v3828_v15 = vadd.f32 %v1616_v0, %v1615_v28  ;;  %v3830_v35 = vadd.f32 %v1622_v2, %v1621_v5  ;;  %v1630_v57 = vrot.slane %v3701_v14, 4 }
 0x138   : > { %v1636_v37 = vrot.slane %v3706_v16, 4  ;;  %v1642_v22 = vrot.slane %v3711_v61, 4  ;;  %v1648_v21 = vrot.slane %v3716_v9, 4  ;;  %v1654_v19 = vrot.slane %v3721_v13, 4 }
 0x139   : > { %v1660_v41 = vrot.slane %v3726_v34, 4  ;;  %v1666_v20 = vrot.slane %v3731_v27, 4  ;;  %v1672_v58 = vrot.slane %v3736_v47, 4  ;;  %v1631_v56 = vadd.f32 %v1630_v57, %v3701_v14 }
 0x13a   : > { %v1637_v63 = vadd.f32 %v1636_v37, %v3706_v16  ;;  %v1643_v4 = vadd.f32 %v1642_v22, %v3711_v61  ;;  %v1649_v11 = vadd.f32 %v1648_v21, %v3716_v9  ;;  %v1655_v12 = vadd.f32 %v1654_v19, %v3721_v13 }
 0x13b   : > { %v1661_v17 = vadd.f32 %v1660_v41, %v3726_v34  ;;  %v1667_v18 = vadd.f32 %v1666_v20, %v3731_v27  ;;  %v1673_v7 = vadd.f32 %v1672_v58, %v3736_v47  ;;  %v1632_v33 = vrot.slane %v1631_v56, 2 }
 0x13c   : > { %v1638_v28 = vrot.slane %v1637_v63, 2  ;;  %v1644_v5 = vrot.slane %v1643_v4, 2  ;;  %v1650_v26 = vrot.slane %v1649_v11, 2  ;;  %v1656_v25 = vrot.slane %v1655_v12, 2 }
 0x13d   : > { %v1662_v14 = vrot.slane %v1661_v17, 2  ;;  %v1668_v3 = vrot.slane %v1667_v18, 2  ;;  %v1674_v16 = vrot.slane %v1673_v7, 2  ;;  %v1633_v55 = vadd.f32 %v1632_v33, %v1631_v56 }
 0x13e   : > { %v1639_v61 = vadd.f32 %v1638_v28, %v1637_v63  ;;  %v1645_v59 = vadd.f32 %v1644_v5, %v1643_v4  ;;  %v1651_v9 = vadd.f32 %v1650_v26, %v1649_v11  ;;  %v1657_v48 = vadd.f32 %v1656_v25, %v1655_v12 }
 0x13f   : > { %v1663_v13 = vadd.f32 %v1662_v14, %v1661_v17  ;;  %v1669_v0 = vadd.f32 %v1668_v3, %v1667_v18  ;;  %v1675_v34 = vadd.f32 %v1674_v16, %v1673_v7  ;;  %v1634_v2 = vrot.slane %v1633_v55, 1 }
 0x140   : > { %v1640_v27 = vrot.slane %v1639_v61, 1  ;;  %v1646_v57 = vrot.slane %v1645_v59, 1  ;;  %v1652_v47 = vrot.slane %v1651_v9, 1  ;;  %v3848_v37 = vadd.f32 %v1628_v29, %v1627_v54 }
 0x141   : > { %v1658_v22 = vrot.slane %v1657_v48, 1  ;;  %v1664_v21 = vrot.slane %v1663_v13, 1  ;;  %v1670_v19 = vrot.slane %v1669_v0, 1  ;;  %v3850_v41 = vadd.f32 %v1634_v2, %v1633_v55 }
 0x142   : > { %v3852_v20 = vadd.f32 %v1640_v27, %v1639_v61  ;;  %v3854_v58 = vadd.f32 %v1646_v57, %v1645_v59  ;;  %v1676_v56 = vrot.slane %v1675_v34, 1  ;;  %v3856_v63 = vadd.f32 %v1652_v47, %v1651_v9 }
 0x143   : > { %v3858_v4 = vadd.f32 %v1658_v22, %v1657_v48  ;;  %v3860_v11 = vadd.f32 %v1664_v21, %v1663_v13  ;;  %v3862_v12 = vadd.f32 %v1670_v19, %v1669_v0  ;;  %v1678_v54 = vrot.slane %v3741_v51, 4 }
 0x144   : > { %v1684_v29 = vrot.slane %v3746_v30, 4  ;;  %v1690_v17 = vrot.slane %v3751_v1, 4  ;;  %v1696_v18 = vrot.slane %v3756_v40, 4  ;;  %v1702_v7 = vrot.slane %v3761_v60, 4 }
 0x145   : > { %v1708_v33 = vrot.slane %v3766_v36, 4  ;;  %v1714_v28 = vrot.slane %v3771_v39, 4  ;;  %v1720_v5 = vrot.slane %v3776_v44, 4  ;;  %v1679_v26 = vadd.f32 %v1678_v54, %v3741_v51 }
 0x146   : > { %v1685_v25 = vadd.f32 %v1684_v29, %v3746_v30  ;;  %v1691_v14 = vadd.f32 %v1690_v17, %v3751_v1  ;;  %v1697_v3 = vadd.f32 %v1696_v18, %v3756_v40  ;;  %v1703_v16 = vadd.f32 %v1702_v7, %v3761_v60 }
 0x147   : > { %v1709_v55 = vadd.f32 %v1708_v33, %v3766_v36  ;;  %v1715_v61 = vadd.f32 %v1714_v28, %v3771_v39  ;;  %v1721_v59 = vadd.f32 %v1720_v5, %v3776_v44  ;;  %v1680_v9 = vrot.slane %v1679_v26, 2 }
 0x148   : > { %v1686_v48 = vrot.slane %v1685_v25, 2  ;;  %v1692_v13 = vrot.slane %v1691_v14, 2  ;;  %v1698_v0 = vrot.slane %v1697_v3, 2  ;;  %v1704_v2 = vrot.slane %v1703_v16, 2 }
 0x149   : > { %v1710_v51 = vrot.slane %v1709_v55, 2  ;;  %v1716_v27 = vrot.slane %v1715_v61, 2  ;;  %v1722_v30 = vrot.slane %v1721_v59, 2  ;;  %v1681_v57 = vadd.f32 %v1680_v9, %v1679_v26 }
 0x14a   : > { %v1687_v1 = vadd.f32 %v1686_v48, %v1685_v25  ;;  %v1693_v47 = vadd.f32 %v1692_v13, %v1691_v14  ;;  %v1699_v40 = vadd.f32 %v1698_v0, %v1697_v3  ;;  %v1705_v22 = vadd.f32 %v1704_v2, %v1703_v16 }
 0x14b   : > { %v1711_v60 = vadd.f32 %v1710_v51, %v1709_v55  ;;  %v1717_v21 = vadd.f32 %v1716_v27, %v1715_v61  ;;  %v1723_v36 = vadd.f32 %v1722_v30, %v1721_v59  ;;  %v1682_v19 = vrot.slane %v1681_v57, 1 }
 0x14c   : > { %v1688_v39 = vrot.slane %v1687_v1, 1  ;;  %v1694_v54 = vrot.slane %v1693_v47, 1  ;;  %v1700_v44 = vrot.slane %v1699_v40, 1  ;;  %v3880_v29 = vadd.f32 %v1676_v56, %v1675_v34 }
 0x14d   : > { %v1706_v17 = vrot.slane %v1705_v22, 1  ;;  %v1712_v18 = vrot.slane %v1711_v60, 1  ;;  %v1718_v7 = vrot.slane %v1717_v21, 1  ;;  %v3882_v33 = vadd.f32 %v1682_v19, %v1681_v57 }
 0x14e   : > { %v3884_v28 = vadd.f32 %v1688_v39, %v1687_v1  ;;  %v3886_v5 = vadd.f32 %v1694_v54, %v1693_v47  ;;  %v1724_v26 = vrot.slane %v1723_v36, 1  ;;  %v3888_v25 = vadd.f32 %v1700_v44, %v1699_v40 }
 0x14f   : > { %v3890_v14 = vadd.f32 %v1706_v17, %v1705_v22  ;;  %v3892_v3 = vadd.f32 %v1712_v18, %v1711_v60  ;;  %v3894_v16 = vadd.f32 %v1718_v7, %v1717_v21  ;;  %v1726_v34 = vrot.slane %v3781_v49, 4 }
 0x150   : > { %v1732_v56 = vrot.slane %v3786_v45, 4  ;;  %v1738_v55 = vrot.slane %v3791_v52, 4  ;;  %v1744_v61 = vrot.slane %v3796_v38, 4  ;;  %v1750_v59 = vrot.slane %v3801_v10, 4 }
 0x151   : > { %v1756_v9 = vrot.slane %v3806_v50, 4  ;;  %v1762_v48 = vrot.slane %v3811_v53, 4  ;;  %v1768_v13 = vrot.slane %v3816_v62, 4  ;;  %v1727_v0 = vadd.f32 %v1726_v34, %v3781_v49 }
 0x152   : > { %v1733_v2 = vadd.f32 %v1732_v56, %v3786_v45  ;;  %v1739_v51 = vadd.f32 %v1738_v55, %v3791_v52  ;;  %v1745_v27 = vadd.f32 %v1744_v61, %v3796_v38  ;;  %v1751_v30 = vadd.f32 %v1750_v59, %v3801_v10 }
 0x153   : > { %v1757_v57 = vadd.f32 %v1756_v9, %v3806_v50  ;;  %v1763_v1 = vadd.f32 %v1762_v48, %v3811_v53  ;;  %v1769_v47 = vadd.f32 %v1768_v13, %v3816_v62  ;;  %v1728_v40 = vrot.slane %v1727_v0, 2 }
 0x154   : > { %v1734_v22 = vrot.slane %v1733_v2, 2  ;;  %v1740_v60 = vrot.slane %v1739_v51, 2  ;;  %v1746_v21 = vrot.slane %v1745_v27, 2  ;;  %v1752_v19 = vrot.slane %v1751_v30, 2 }
 0x155   : > { %v1758_v49 = vrot.slane %v1757_v57, 2  ;;  %v1764_v39 = vrot.slane %v1763_v1, 2  ;;  %v1770_v45 = vrot.slane %v1769_v47, 2  ;;  %v1729_v54 = vadd.f32 %v1728_v40, %v1727_v0 }
 0x156   : > { %v1735_v52 = vadd.f32 %v1734_v22, %v1733_v2  ;;  %v1741_v44 = vadd.f32 %v1740_v60, %v1739_v51  ;;  %v1747_v38 = vadd.f32 %v1746_v21, %v1745_v27  ;;  %v1753_v17 = vadd.f32 %v1752_v19, %v1751_v30  ;;  %v1779_v60 = vld [vmem:[#allocation3 + $0x14] sm:$0xf]  ;;  %v1781_v21 = vld [vmem:[#allocation3 + $0x1c] sm:$0xf] }
 0x157   : > { %v1759_v10 = vadd.f32 %v1758_v49, %v1757_v57  ;;  %v1765_v18 = vadd.f32 %v1764_v39, %v1763_v1  ;;  %v1771_v50 = vadd.f32 %v1770_v45, %v1769_v47  ;;  %v1730_v7 = vrot.slane %v1729_v54, 1 }
 0x158   : > { %v1736_v53 = vrot.slane %v1735_v52, 1  ;;  %v1742_v34 = vrot.slane %v1741_v44, 1  ;;  %v1748_v62 = vrot.slane %v1747_v38, 1  ;;  %v1754_v56 = vrot.slane %v1753_v17, 1 }
 0x159   : > { %v1760_v55 = vrot.slane %v1759_v10, 1  ;;  %v1766_v61 = vrot.slane %v1765_v18, 1  ;;  %v1772_v59 = vrot.slane %v1771_v50, 1  ;;  %v1725_v9 = vadd.f32 %v1724_v26, %v1723_v36 }
 0x15a   : > { %v1731_v48 = vadd.f32 %v1730_v7, %v1729_v54  ;;  %v1737_v13 = vadd.f32 %v1736_v53, %v1735_v52  ;;  %v1743_v42 = vadd.f32 %v1742_v34, %v1741_v44  ;;  %v1749_v0 = vadd.f32 %v1748_v62, %v1747_v38 }
 0x15b   : > { %v1755_v2 = vadd.f32 %v1754_v56, %v1753_v17  ;;  %v1761_v51 = vadd.f32 %v1760_v55, %v1759_v10  ;;  %v1767_v27 = vadd.f32 %v1766_v61, %v1765_v18  ;;  %v1773_v30 = vadd.f32 %v1772_v59, %v1771_v50 }
 0x15c   : > { %v1815_v57 = vsel %vm1814_vm2, %v3820_v32, %v3818_v43  ;;  %v1820_v1 = vsel %vm1814_vm2, %v3828_v15, %v3826_v46  ;;  %v1823_v36 = vsel %vm1814_vm2, %v3852_v20, %v3850_v41  ;;  %v1826_v26 = vsel %vm1814_vm2, %v3860_v11, %v3858_v4  ;;  %v1774_v46 = vld [vmem:[#allocation3] sm:$0xf]  ;;  %v1775_v15 = vld [vmem:[#allocation3 + $0x4] sm:$0xf]  ;;  %v1776_v4 = vld [vmem:[#allocation3 + $0x8] sm:$0xf] }
 0x15d   : > { %v1817_v47 = vsel %vm1816_vm3, %v3822_v31, %v1815_v57  ;;  %v1821_v40 = vsel %vm1816_vm3, %v3830_v35, %v1820_v1  ;;  %v1824_v43 = vsel %vm1816_vm3, %v3854_v58, %v1823_v36  ;;  %v1827_v32 = vsel %vm1816_vm3, %v3862_v12, %v1826_v26  ;;  %v1777_v11 = vld [vmem:[#allocation3 + $0xc] sm:$0xf]  ;;  %v1778_v58 = vld [vmem:[#allocation3 + $0x10] sm:$0xf] }
 0x15e   : > { %v1819_v41 = vsel %vm1818_vm4, %v3824_v24, %v1817_v47  ;;  %v1822_v20 = vsel %vm1818_vm4, %v3848_v37, %v1821_v40  ;;  %v1825_v31 = vsel %vm1818_vm4, %v3856_v63, %v1824_v43  ;;  %v1828_v35 = vsel %vm1818_vm4, %v3880_v29, %v1827_v32  ;;  %v1780_v63 = vld [vmem:[#allocation3 + $0x18] sm:$0xf] }
 0x15f   : > { %v1829_v12 = vsel %vm1814_vm2, %v3884_v28, %v3882_v33  ;;  %v1832_v24 = vsel %vm1814_vm2, %v3892_v3, %v3890_v14  ;;  %v1835_v22 = vsel %vm1814_vm2, %v1737_v13, %v1731_v48  ;;  %v1838_v37 = vsel %vm1814_vm2, %v1761_v51, %v1755_v2 }
 0x160   : > { %v1830_v29 = vsel %vm1816_vm3, %v3886_v5, %v1829_v12  ;;  %v1833_v19 = vsel %vm1816_vm3, %v3894_v16, %v1832_v24  ;;  %v1836_v49 = vsel %vm1816_vm3, %v1743_v42, %v1835_v22  ;;  %v1839_v33 = vsel %vm1816_vm3, %v1767_v27, %v1838_v37 }
 0x161   : > { %v1831_v28 = vsel %vm1818_vm4, %v3888_v25, %v1830_v29  ;;  %v1834_v14 = vsel %vm1818_vm4, %v1725_v9, %v1833_v19  ;;  %v1837_v3 = vsel %vm1818_vm4, %v1749_v0, %v1836_v49  ;;  %v1840_v39 = vsel %vm1818_vm4, %v1773_v30, %v1839_v33 }
 0x162   : > { %v1849_v45 = vadd.f32 %v1819_v41, %v1774_v46  ;;  %v1850_v54 = vadd.f32 %v1822_v20, %v1775_v15  ;;  %v1851_v52 = vadd.f32 %v1825_v31, %v1776_v4  ;;  %v1852_v5 = vadd.f32 %v1828_v35, %v1777_v11 }
 0x163   : > { %v1853_v44 = vadd.f32 %v1831_v28, %v1778_v58  ;;  %v1854_v38 = vadd.f32 %v1834_v14, %v1779_v60  ;;  %v1855_v16 = vadd.f32 %v1837_v3, %v1780_v63  ;;  %v1856_v17 = vadd.f32 %v1840_v39, %v1781_v21 }
 0x164   : > { %1857 = vst [vmem:[#allocation3] sm:$0xf] %v1849_v45  ;;  %1858 = vst [vmem:[#allocation3 + $0x4] sm:$0xf] %v1850_v54 }
 0x165   : > { %1859 = vst [vmem:[#allocation3 + $0x8] sm:$0xf] %v1851_v52  ;;  %1860 = vst [vmem:[#allocation3 + $0xc] sm:$0xf] %v1852_v5 }
 0x166   : > { %1861 = vst [vmem:[#allocation3 + $0x10] sm:$0xf] %v1853_v44  ;;  %1862 = vst [vmem:[#allocation3 + $0x14] sm:$0xf] %v1854_v38 }
 0x167   : > { %1863 = vst [vmem:[#allocation3 + $0x18] sm:$0xf] %v1855_v16  ;;  %1864 = vst [vmem:[#allocation3 + $0x1c] sm:$0xf] %v1856_v17 }
 0x16b   : > { %v3959_v42 = vld [vmem:[#allocation3] sm:$0xf]  ;;  %v3961_v25 = vld [vmem:[#allocation3 + $0x4] sm:$0xf] }
 0x16c   : > { %v3963_v10 = vld [vmem:[#allocation3 + $0x8] sm:$0xf]  ;;  %v3965_v18 = vld [vmem:[#allocation3 + $0xc] sm:$0xf]  ;;  %v1873_v34 = vsel %vm779_vm1, %v3959_v42, -inf  ;;  %v1880_v62 = vsel %vm779_vm1, %v3961_v25, -inf }
 0x16d   : > { %v3967_v50 = vld [vmem:[#allocation3 + $0x10] sm:$0xf]  ;;  %v3969_v7 = vld [vmem:[#allocation3 + $0x14] sm:$0xf]  ;;  %v1874_v55 = vrot.slane %v1873_v34, 4  ;;  %v1881_v61 = vrot.slane %v1880_v62, 4 }
 0x16e   : > { %v3971_v53 = vld [vmem:[#allocation3 + $0x18] sm:$0xf]  ;;  %v3977_v56 = vld [vmem:[#allocation3 + $0x1c] sm:$0xf]  ;;  %v1887_v59 = vsel %vm779_vm1, %v3963_v10, -inf  ;;  %v1894_v9 = vsel %vm779_vm1, %v3965_v18, -inf }
 0x16f   : > { %v1888_v48 = vrot.slane %v1887_v59, 4  ;;  %v1895_v13 = vrot.slane %v1894_v9, 4  ;;  %v1901_v0 = vsel %vm779_vm1, %v3967_v50, -inf  ;;  %v1908_v2 = vsel %vm779_vm1, %v3969_v7, -inf }
 0x170   : > { %v1875_v51 = vmax.f32 %v1873_v34, %v1874_v55  ;;  %v1882_v27 = vmax.f32 %v1880_v62, %v1881_v61  ;;  %v1902_v30 = vrot.slane %v1901_v0, 4  ;;  %v1909_v57 = vrot.slane %v1908_v2, 4 }
 0x171   : > { %v1889_v1 = vmax.f32 %v1887_v59, %v1888_v48  ;;  %v1896_v36 = vmax.f32 %v1894_v9, %v1895_v13  ;;  %v1915_v26 = vsel %vm779_vm1, %v3971_v53, -inf  ;;  %v1922_v47 = vsel %vm779_vm1, %v3977_v56, -inf }
 0x172   : > { %v1876_v40 = vrot.slane %v1875_v51, 2  ;;  %v1883_v43 = vrot.slane %v1882_v27, 2  ;;  %v1903_v32 = vmax.f32 %v1901_v0, %v1902_v30  ;;  %v1910_v46 = vmax.f32 %v1908_v2, %v1909_v57 }
 0x173   : > { %v1890_v15 = vrot.slane %v1889_v1, 2  ;;  %v1897_v41 = vrot.slane %v1896_v36, 2  ;;  %v1916_v20 = vrot.slane %v1915_v26, 4  ;;  %v1923_v31 = vrot.slane %v1922_v47, 4 }
 0x174   : > { %v1877_v35 = vmax.f32 %v1875_v51, %v1876_v40  ;;  %v1884_v4 = vmax.f32 %v1882_v27, %v1883_v43  ;;  %v1904_v11 = vrot.slane %v1903_v32, 2  ;;  %v1911_v58 = vrot.slane %v1910_v46, 2 }
 0x175   : > { %v1891_v12 = vmax.f32 %v1889_v1, %v1890_v15  ;;  %v1898_v24 = vmax.f32 %v1896_v36, %v1897_v41  ;;  %v1917_v22 = vmax.f32 %v1915_v26, %v1916_v20  ;;  %v1924_v37 = vmax.f32 %v1922_v47, %v1923_v31 }
 0x176   : > { %v1878_v60 = vrot.slane %v1877_v35, 1  ;;  %v1885_v63 = vrot.slane %v1884_v4, 1  ;;  %v1905_v21 = vmax.f32 %v1903_v32, %v1904_v11  ;;  %v1912_v29 = vmax.f32 %v1910_v46, %v1911_v58 }
 0x177   : > { %v1892_v19 = vrot.slane %v1891_v12, 1  ;;  %v1899_v49 = vrot.slane %v1898_v24, 1  ;;  %v1918_v33 = vrot.slane %v1917_v22, 2  ;;  %v1925_v28 = vrot.slane %v1924_v37, 2 }
 0x178   : > { %v1879_v14 = vmax.f32 %v1877_v35, %v1878_v60  ;;  %v1886_v3 = vmax.f32 %v1884_v4, %v1885_v63  ;;  %v1906_v39 = vrot.slane %v1905_v21, 1  ;;  %v1913_v45 = vrot.slane %v1912_v29, 1 }
 0x179   : > { %v1893_v54 = vmax.f32 %v1891_v12, %v1892_v19  ;;  %v1900_v52 = vmax.f32 %v1898_v24, %v1899_v49  ;;  %v1919_v5 = vmax.f32 %v1917_v22, %v1918_v33  ;;  %v1926_v44 = vmax.f32 %v1924_v37, %v1925_v28 }
 0x17a   : > { %v1907_v38 = vmax.f32 %v1905_v21, %v1906_v39  ;;  %v1914_v16 = vmax.f32 %v1912_v29, %v1913_v45  ;;  %v1929_v17 = vsub.f32 %v3959_v42, %v1879_v14  ;;  %v1930_v34 = vsub.f32 %v3961_v25, %v1886_v3 }
 0x17b   : > { %v1920_v62 = vrot.slane %v1919_v5, 1  ;;  %v1927_v55 = vrot.slane %v1926_v44, 1  ;;  %v1931_v61 = vsub.f32 %v3963_v10, %v1893_v54  ;;  %v1932_v59 = vsub.f32 %v3965_v18, %v1900_v52 }
 0x17c   : > { %v1933_v9 = vsub.f32 %v3967_v50, %v1907_v38  ;;  %v1934_v48 = vsub.f32 %v3969_v7, %v1914_v16  ;;  %v1937_v13 = vmul.f32 1.442695, %v1929_v17  ;;  %v1939_v0 = vmul.f32 1.442695, %v1930_v34 }
 0x17d   : > { %v1921_v2 = vmax.f32 %v1919_v5, %v1920_v62  ;;  %v1928_v51 = vmax.f32 %v1926_v44, %v1927_v55  ;;  %v1941_v27 = vmul.f32 1.442695, %v1931_v61  ;;  %v1943_v30 = vmul.f32 1.442695, %v1932_v59 }
 0x17e   : > { %3166 = vpow2.f32 %v1937_v13  ;;  %v1945_v42 = vmul.f32 1.442695, %v1933_v9  ;;  %v1947_v10 = vmul.f32 1.442695, %v1934_v48 }
 0x17f   : > { %v1935_v25 = vsub.f32 %v3971_v53, %v1921_v2  ;;  %v1936_v57 = vsub.f32 %v3977_v56, %v1928_v51  ;;  %3168 = vpow2.f32 %v1939_v0 }
 0x180   : > { %3170 = vpow2.f32 %v1941_v27 }
 0x181   : > { %3172 = vpow2.f32 %v1943_v30  ;;  %v1949_v18 = vmul.f32 1.442695, %v1935_v25  ;;  %v1951_v50 = vmul.f32 1.442695, %v1936_v57 }
 0x182   : > { %3174 = vpow2.f32 %v1945_v42 }
 0x183   : > { %3176 = vpow2.f32 %v1947_v10 }
 0x184   : > { %3178 = vpow2.f32 %v1949_v18 }
 0x185   : > { %3180 = vpow2.f32 %v1951_v50 }
 0x18b   : > { %v3999_v7 = vpop.eup %3166 }
 0x18c   : > { %v4001_v1 = vpop.eup %3168  ;;  %v1953_v36 = vsel %vm779_vm1, %v3999_v7, 0.0 }
 0x18d   : > { %v4005_v53 = vpop.eup %3170  ;;  %v1954_v56 = vrot.slane %v1953_v36, 4  ;;  %v1960_v26 = vsel %vm779_vm1, %v4001_v1, 0.0 }
 0x18e   : > { %v4009_v47 = vpop.eup %3172  ;;  %v1961_v40 = vrot.slane %v1960_v26, 4  ;;  %v1967_v43 = vsel %vm779_vm1, %v4005_v53, 0.0 }
 0x18f   : > { %v4013_v32 = vpop.eup %3174  ;;  %v1955_v46 = vadd.f32 %v1954_v56, %v1953_v36  ;;  %v1968_v15 = vrot.slane %v1967_v43, 4  ;;  %v1974_v41 = vsel %vm779_vm1, %v4009_v47, 0.0 }
 0x190   : > { %v4017_v20 = vpop.eup %3176  ;;  %v1962_v31 = vadd.f32 %v1961_v40, %v1960_v26  ;;  %v1975_v35 = vrot.slane %v1974_v41, 4  ;;  %v1981_v4 = vsel %vm779_vm1, %v4013_v32, 0.0 }
 0x191   : > { %v4021_v11 = vpop.eup %3178  ;;  %v1956_v58 = vrot.slane %v1955_v46, 2  ;;  %v1969_v12 = vadd.f32 %v1968_v15, %v1967_v43  ;;  %v1982_v24 = vrot.slane %v1981_v4, 4  ;;  %v1988_v22 = vsel %vm779_vm1, %v4017_v20, 0.0 }
 0x192   : > { %v4025_v37 = vpop.eup %3180  ;;  %v1963_v60 = vrot.slane %v1962_v31, 2  ;;  %v1976_v63 = vadd.f32 %v1975_v35, %v1974_v41  ;;  %v1989_v21 = vrot.slane %v1988_v22, 4  ;;  %v1995_v29 = vsel %vm779_vm1, %v4021_v11, 0.0 }
 0x193   : > { %v1957_v19 = vadd.f32 %v1956_v58, %v1955_v46  ;;  %v1970_v49 = vrot.slane %v1969_v12, 2  ;;  %v1983_v33 = vadd.f32 %v1982_v24, %v1981_v4  ;;  %v1996_v28 = vrot.slane %v1995_v29, 4 }
 0x194   : > { %v1964_v14 = vadd.f32 %v1963_v60, %v1962_v31  ;;  %v1977_v3 = vrot.slane %v1976_v63, 2  ;;  %v1990_v39 = vadd.f32 %v1989_v21, %v1988_v22  ;;  %v2002_v45 = vsel %vm779_vm1, %v4025_v37, 0.0 }
 0x195   : > { %v1958_v54 = vrot.slane %v1957_v19, 1  ;;  %v1971_v52 = vadd.f32 %v1970_v49, %v1969_v12  ;;  %v1984_v5 = vrot.slane %v1983_v33, 2  ;;  %v1997_v44 = vadd.f32 %v1996_v28, %v1995_v29 }
 0x196   : > { %v1965_v38 = vrot.slane %v1964_v14, 1  ;;  %v1978_v16 = vadd.f32 %v1977_v3, %v1976_v63  ;;  %v1991_v17 = vrot.slane %v1990_v39, 2  ;;  %v2003_v34 = vrot.slane %v2002_v45, 4 }
 0x197   : > { %v1959_v62 = vadd.f32 %v1958_v54, %v1957_v19  ;;  %v1972_v55 = vrot.slane %v1971_v52, 1  ;;  %v1985_v61 = vadd.f32 %v1984_v5, %v1983_v33  ;;  %v1998_v59 = vrot.slane %v1997_v44, 2 }
 0x198   : > { %v1966_v9 = vadd.f32 %v1965_v38, %v1964_v14  ;;  %v1979_v48 = vrot.slane %v1978_v16, 1  ;;  %v1992_v13 = vadd.f32 %v1991_v17, %v1990_v39  ;;  %v2004_v0 = vadd.f32 %v2003_v34, %v2002_v45 }
 0x199   : > { %v1973_v2 = vadd.f32 %v1972_v55, %v1971_v52  ;;  %v1986_v51 = vrot.slane %v1985_v61, 1  ;;  %v1999_v27 = vadd.f32 %v1998_v59, %v1997_v44  ;;  %3182 = vrcp.f32 %v1959_v62 }
 0x19a   : > { %v1980_v30 = vadd.f32 %v1979_v48, %v1978_v16  ;;  %v1993_v42 = vrot.slane %v1992_v13, 1  ;;  %v2005_v25 = vrot.slane %v2004_v0, 2  ;;  %3184 = vrcp.f32 %v1966_v9 }
 0x19b   : > { %v1987_v57 = vadd.f32 %v1986_v51, %v1985_v61  ;;  %v2000_v10 = vrot.slane %v1999_v27, 1  ;;  %3186 = vrcp.f32 %v1973_v2 }
 0x19c   : > { %v1994_v18 = vadd.f32 %v1993_v42, %v1992_v13  ;;  %v2006_v50 = vadd.f32 %v2005_v25, %v2004_v0  ;;  %3188 = vrcp.f32 %v1980_v30 }
 0x19d   : > { %v2001_v36 = vadd.f32 %v2000_v10, %v1999_v27  ;;  %3190 = vrcp.f32 %v1987_v57 }
 0x19e   : > { %v2007_v56 = vrot.slane %v2006_v50, 1  ;;  %3192 = vrcp.f32 %v1994_v18 }
 0x19f   : > { %3194 = vrcp.f32 %v2001_v36 }
 0x1a0   : > { %v2008_v26 = vadd.f32 %v2007_v56, %v2006_v50 }
 0x1a2   : > { %3196 = vrcp.f32 %v2008_v26 }
 0x1a6   : > { %v3183_v40 = vpop.eup %3182 }
 0x1a7   : > { %v3185_v43 = vpop.eup %3184  ;;  %v2017_v15 = vmul.f32 %v3183_v40, %v3999_v7 }
 0x1a8   : > { %v3187_v46 = vpop.eup %3186  ;;  %v2018_v31 = vmul.f32 %v3185_v43, %v4001_v1 }
 0x1a9   : > { %v3189_v41 = vpop.eup %3188  ;;  %v2019_v35 = vmul.f32 %v3187_v46, %v4005_v53  ;;  %v2103_v60 = vrot.slane %v2017_v15, %v3445_v8 }
 0x1aa   : > { %v3191_v4 = vpop.eup %3190  ;;  %v2020_v58 = vmul.f32 %v3189_v41, %v4009_v47  ;;  %v2127_v63 = vrot.slane %v2018_v31, %v3445_v8 }
 0x1ab   : > { %v3193_v12 = vpop.eup %3192  ;;  %v2021_v24 = vmul.f32 %v3191_v4, %v4013_v32  ;;  %v2151_v21 = vrot.slane %v2019_v35, %v3445_v8  ;;  %v2104_v49 = vcombine.high %v2103_v60, %v2103_v60 }
 0x1ac   : > { %v3195_v22 = vpop.eup %3194  ;;  %v2022_v7 = vmul.f32 %v3193_v12, %v4017_v20  ;;  %v2175_v1 = vrot.slane %v2020_v58, %v3445_v8  ;;  %v2128_v32 = vcombine.high %v2127_v63, %v2127_v63  ;;  %v2111_v20 = vrot.slane %v2103_v60, %v3445_v8 }
 0x1ad   : > { %v2023_v29 = vmul.f32 %v3195_v22, %v4021_v11  ;;  %v2199_v19 = vrot.slane %v2021_v24, %v3445_v8  ;;  %v2152_v33 = vcombine.high %v2151_v21, %v2151_v21  ;;  %v2135_v11 = vrot.slane %v2127_v63, %v3445_v8 }
 0x1ae   : > { %v2176_v28 = vcombine.high %v2175_v1, %v2175_v1  ;;  %v2223_v14 = vrot.slane %v2022_v7, %v3445_v8  ;;  %v2118_v54 = vrot.slane %v2104_v49, %v3445_v8  ;;  %v2142_v52 = vrot.slane %v2128_v32, %v3445_v8 }
 0x1af   : > { %v3197_v53 = vpop.eup %3196  ;;  %v2247_v3 = vrot.slane %v2023_v29, %v3445_v8  ;;  %v2200_v45 = vcombine.high %v2199_v19, %v2199_v19  ;;  %v4055_v38 = vrot.slane %v2152_v33, %v3445_v8  ;;  %v4058_v16 = vrot.slane %v2175_v1, %v3445_v8 }
 0x1b0   : > { %v2024_v47 = vmul.f32 %v3197_v53, %v4025_v37  ;;  %v4052_v37 = vrot.slane %v2151_v21, %v3445_v8  ;;  %v2224_v5 = vcombine.high %v2223_v14, %v2223_v14  ;;  %v4061_v17 = vrot.slane %v2176_v28, %v3445_v8 }
 0x1b1   : > { %v2248_v44 = vcombine.high %v2247_v3, %v2247_v3  ;;  %v2119_v62 = vcombine.high %v2111_v20, %v2111_v20  ;;  %v2143_v55 = vcombine.high %v2135_v11, %v2135_v11  ;;  %v4064_v61 = vrot.slane %v2199_v19, %v3445_v8 }
 0x1b2   : > { %v2271_v39 = vrot.slane %v2024_v47, %v3445_v8  ;;  %v4067_v59 = vrot.slane %v2200_v45, %v3445_v8  ;;  %v2120_v9 = vcombine.high %v2118_v54, %v2118_v54  ;;  %v4070_v48 = vrot.slane %v2223_v14, %v3445_v8 }
 0x1b3   : > { %v4073_v13 = vrot.slane %v2247_v3, %v3445_v8  ;;  %v2144_v2 = vcombine.high %v2142_v52, %v2142_v52  ;;  %v2167_v51 = vcombine.high %v4052_v37, %v4052_v37  ;;  %v4081_v27 = vrot.slane %v2224_v5, %v3445_v8 }
 0x1b4   : > { %v2272_v34 = vcombine.high %v2271_v39, %v2271_v39  ;;  %v4076_v0 = vrot.slane %v2271_v39, %v3445_v8  ;;  %v4084_v30 = vrot.slane %v2248_v44, %v3445_v8  ;;  %v2168_v42 = vcombine.high %v4055_v38, %v4055_v38 }
 0x1b5   : > { %v2191_v25 = vcombine.high %v4058_v16, %v4058_v16  ;;  %v2192_v57 = vcombine.high %v4061_v17, %v4061_v17  ;;  %v2215_v18 = vcombine.high %v4064_v61, %v4064_v61  ;;  %v2216_v50 = vcombine.high %v4067_v59, %v4067_v59 }
 0x1b6   : > { %v4093_v10 = vrot.slane %v2272_v34, %v3445_v8  ;;  %v2292_v36 = vrot.slane %v2111_v20, %v3315_v6  ;;  %v2296_v56 = vrot.slane %v2118_v54, %v3315_v6  ;;  %v2239_v26 = vcombine.high %v4070_v48, %v4070_v48  ;;  %v4336_v54 = vld [vmem:[#allocation8_spill] sm:$0xff] }
 0x1b7   : > { %v2263_v40 = vcombine.high %v4073_v13, %v4073_v13  ;;  %v2287_v43 = vcombine.high %v4076_v0, %v4076_v0  ;;  %v2300_v46 = vrot.slane %v2119_v62, %v3315_v6  ;;  %v2240_v15 = vcombine.high %v4081_v27, %v4081_v27 }
 0x1b8   : > { %v2264_v41 = vcombine.high %v4084_v30, %v4084_v30  ;;  %v2304_v31 = vrot.slane %v2120_v9, %v3315_v6  ;;  %v2308_v35 = vrot.slane %v2135_v11, %v3315_v6  ;;  %v2288_v4 = vcombine.high %v4093_v10, %v4093_v10 }
 0x1b9   : > { %v2312_v58 = vrot.slane %v2142_v52, %v3315_v6  ;;  %v2316_v12 = vrot.slane %v2143_v55, %v3315_v6  ;;  %v2320_v24 = vrot.slane %v2144_v2, %v3315_v6  ;;  %v2324_v22 = vrot.slane %v4052_v37, %v3315_v6  ;;  %v4342_v55 = vld [vmem:[#allocation9_spill] sm:$0xff] }
 0x1ba   : > { %v2328_v60 = vrot.slane %v4055_v38, %v3315_v6  ;;  %v2332_v63 = vrot.slane %v2167_v51, %v3315_v6  ;;  %v2336_v21 = vrot.slane %v2168_v42, %v3315_v6  ;;  %v2340_v7 = vrot.slane %v4058_v16, %v3315_v6  ;;  %v4339_v38 = vld [vmem:[#allocation7_spill] sm:$0xff] }
 0x1bb   : > { %v2344_v29 = vrot.slane %v4061_v17, %v3315_v6  ;;  %v2348_v1 = vrot.slane %v2191_v25, %v3315_v6  ;;  %v2352_v53 = vrot.slane %v2192_v57, %v3315_v6  ;;  %v2356_v19 = vrot.slane %v4064_v61, %v3315_v6 }
 0x1bc   : > { %v2360_v47 = vrot.slane %v4067_v59, %v3315_v6  ;;  %v2364_v49 = vrot.slane %v2215_v18, %v3315_v6  ;;  %v2368_v32 = vrot.slane %v2216_v50, %v3315_v6  ;;  %v2372_v33 = vrot.slane %v4070_v48, %v3315_v6  ;;  %v4345_v50 = vld [vmem:[#allocation10_spill] sm:$0xff] }
 0x1bd   : > { %v2376_v28 = vrot.slane %v4081_v27, %v3315_v6  ;;  %v2380_v14 = vrot.slane %v2239_v26, %v3315_v6  ;;  %v2384_v3 = vrot.slane %v2240_v15, %v3315_v6  ;;  %v4334_v39 = vunpack.c.l.bf16 %v3610_v23 }
 0x1be   : > { %v4335_v11 = vunpack.c.h.bf16 %v3610_v23  ;;  %v4337_v52 = vunpack.c.l.bf16 %v4336_v54  ;;  %v4338_v5 = vunpack.c.h.bf16 %v4336_v54  ;;  %v4340_v16 = vunpack.c.l.bf16 %v4339_v38 }
 0x1bf   : > { %v2449_v20 = vmul.f32 %v4334_v39, %v2292_v36  ;;  %v4341_v34 = vunpack.c.h.bf16 %v4339_v38  ;;  %v4343_v61 = vunpack.c.l.bf16 %v4342_v55  ;;  %v4344_v9 = vunpack.c.h.bf16 %v4342_v55 }
 0x1c0   : > { %v2450_v45 = vmul.f32 %v4335_v11, %v2296_v56  ;;  %v2453_v37 = vmul.f32 %v4337_v52, %v2308_v35  ;;  %v2454_v44 = vmul.f32 %v4338_v5, %v2312_v58  ;;  %v2451_v17 = vmul.f32 %v4340_v16, %v2300_v46  ;;  %v4348_v46 = vld [vmem:[#allocation11_spill] sm:$0xff]  ;;  %v4351_v58 = vld [vmem:[#allocation12_spill] sm:$0xff]  ;;  %v4354_v11 = vld [vmem:[#allocation13_spill] sm:$0xff] }
 0x1c1   : > { %v2452_v62 = vmul.f32 %v4341_v34, %v2304_v31  ;;  %v2455_v59 = vmul.f32 %v4343_v61, %v2316_v12  ;;  %v2456_v48 = vmul.f32 %v4344_v9, %v2320_v24  ;;  %v2388_v23 = vrot.slane %v4073_v13, %v3315_v6 }
 0x1c2   : > { %v2392_v2 = vrot.slane %v4084_v30, %v3315_v6  ;;  %v2396_v51 = vrot.slane %v2263_v40, %v3315_v6  ;;  %v2400_v27 = vrot.slane %v2264_v41, %v3315_v6  ;;  %v2404_v42 = vrot.slane %v4076_v0, %v3315_v6 }
 0x1c3   : > { %v2408_v25 = vrot.slane %v4093_v10, %v3315_v6  ;;  %v2412_v57 = vrot.slane %v2287_v43, %v3315_v6  ;;  %v2416_v18 = vrot.slane %v2288_v4, %v3315_v6  ;;  %v4346_v36 = vunpack.c.l.bf16 %v4345_v50 }
 0x1c4   : > { %v4347_v56 = vunpack.c.h.bf16 %v4345_v50  ;;  %v2481_v26 = vadd.f32 %v2453_v37, %v2449_v20  ;;  %v2488_v40 = vadd.f32 %v2454_v44, %v2450_v45  ;;  %v4349_v15 = vunpack.c.l.bf16 %v4348_v46  ;;  %v4357_v37 = vld [vmem:[#allocation14_spill] sm:$0xff] }
 0x1c5   : > { %v2457_v13 = vmul.f32 %v4346_v36, %v2324_v22  ;;  %v4350_v0 = vunpack.c.h.bf16 %v4348_v46  ;;  %v2495_v35 = vadd.f32 %v2455_v59, %v2451_v17  ;;  %v2502_v10 = vadd.f32 %v2456_v48, %v2452_v62  ;;  %v4360_v17 = vld [vmem:[#allocation15_spill] sm:$0xff]  ;;  %v4363_v59 = vld [vmem:[#allocation16_spill] sm:$0xff]  ;;  %v4369_v46 = vld [vmem:[#allocation18_spill] sm:$0xff] }
 0x1c6   : > { %v2458_v30 = vmul.f32 %v4347_v56, %v2328_v60  ;;  %v2459_v41 = vmul.f32 %v4349_v15, %v2332_v63  ;;  %v4352_v43 = vunpack.c.l.bf16 %v4351_v58  ;;  %v4353_v4 = vunpack.c.h.bf16 %v4351_v58 }
 0x1c7   : > { %v2460_v31 = vmul.f32 %v4350_v0, %v2336_v21  ;;  %v2482_v22 = vadd.f32 %v2481_v26, %v2457_v13  ;;  %v4355_v60 = vunpack.c.l.bf16 %v4354_v11  ;;  %v4356_v45 = vunpack.c.h.bf16 %v4354_v11  ;;  %v4366_v13 = vld [vmem:[#allocation17_spill] sm:$0xff] }
 0x1c8   : > { %v2461_v12 = vmul.f32 %v4352_v43, %v2340_v7  ;;  %v2462_v24 = vmul.f32 %v4353_v4, %v2344_v29  ;;  %v2489_v39 = vadd.f32 %v2488_v40, %v2458_v30  ;;  %v2496_v63 = vadd.f32 %v2495_v35, %v2459_v41  ;;  %v4372_v35 = vld [vmem:[#allocation19_spill] sm:$0xff]  ;;  %v4375_v4 = vld [vmem:[#allocation20_spill] sm:$0xff] }
 0x1c9   : > { %v2463_v20 = vmul.f32 %v4355_v60, %v2348_v1  ;;  %v2464_v54 = vmul.f32 %v4356_v45, %v2352_v53  ;;  %v2503_v52 = vadd.f32 %v2502_v10, %v2460_v31  ;;  %v4358_v21 = vunpack.c.l.bf16 %v4357_v37  ;;  %v4378_v60 = vld [vmem:[#allocation21_spill] sm:$0xff] }
 0x1ca   : > { %v4359_v44 = vunpack.c.h.bf16 %v4357_v37  ;;  %v2483_v7 = vadd.f32 %v2482_v22, %v2461_v12  ;;  %v2490_v16 = vadd.f32 %v2489_v39, %v2462_v24  ;;  %v4361_v29 = vunpack.c.l.bf16 %v4360_v17 }
 0x1cb   : > { %v2465_v5 = vmul.f32 %v4358_v21, %v2356_v19  ;;  %v4362_v62 = vunpack.c.h.bf16 %v4360_v17  ;;  %v2497_v1 = vadd.f32 %v2496_v63, %v2463_v20  ;;  %v2504_v61 = vadd.f32 %v2503_v52, %v2464_v54 }
 0x1cc   : > { %v2466_v38 = vmul.f32 %v4359_v44, %v2360_v47  ;;  %v2467_v34 = vmul.f32 %v4361_v29, %v2364_v49  ;;  %v4364_v53 = vunpack.c.l.bf16 %v4363_v59  ;;  %v4365_v48 = vunpack.c.h.bf16 %v4363_v59 }
 0x1cd   : > { %v2468_v55 = vmul.f32 %v4362_v62, %v2368_v32  ;;  %v2484_v19 = vadd.f32 %v2483_v7, %v2465_v5  ;;  %v4367_v47 = vunpack.c.l.bf16 %v4366_v13  ;;  %v4368_v30 = vunpack.c.h.bf16 %v4366_v13 }
 0x1ce   : > { %v2469_v9 = vmul.f32 %v4364_v53, %v2372_v33  ;;  %v2470_v50 = vmul.f32 %v4365_v48, %v2376_v28  ;;  %v2491_v36 = vadd.f32 %v2490_v16, %v2466_v38  ;;  %v2498_v49 = vadd.f32 %v2497_v1, %v2467_v34 }
 0x1cf   : > { %v2471_v56 = vmul.f32 %v4367_v47, %v2380_v14  ;;  %v2472_v26 = vmul.f32 %v4368_v30, %v2384_v3  ;;  %v2505_v40 = vadd.f32 %v2504_v61, %v2468_v55  ;;  %v4370_v32 = vunpack.c.l.bf16 %v4369_v46 }
 0x1d0   : > { %v4371_v41 = vunpack.c.h.bf16 %v4369_v46  ;;  %v2485_v33 = vadd.f32 %v2484_v19, %v2469_v9  ;;  %v2492_v31 = vadd.f32 %v2491_v36, %v2470_v50  ;;  %v4373_v28 = vunpack.c.l.bf16 %v4372_v35 }
 0x1d1   : > { %v2473_v15 = vmul.f32 %v4370_v32, %v2388_v23  ;;  %v4374_v58 = vunpack.c.h.bf16 %v4372_v35  ;;  %v2499_v14 = vadd.f32 %v2498_v49, %v2471_v56  ;;  %v2506_v12 = vadd.f32 %v2505_v40, %v2472_v26 }
 0x1d2   : > { %v2474_v0 = vmul.f32 %v4371_v41, %v2392_v2  ;;  %v2475_v10 = vmul.f32 %v4373_v28, %v2396_v51  ;;  %v4376_v3 = vunpack.c.l.bf16 %v4375_v4  ;;  %v4377_v22 = vunpack.c.h.bf16 %v4375_v4 }
 0x1d3   : > { %v2476_v43 = vmul.f32 %v4374_v58, %v2400_v27  ;;  %v2486_v23 = vadd.f32 %v2485_v33, %v2473_v15  ;;  %v4379_v2 = vunpack.c.l.bf16 %v4378_v60  ;;  %v4380_v45 = vunpack.c.h.bf16 %v4378_v60 }
 0x1d4   : > { %v2477_v24 = vmul.f32 %v4376_v3, %v2404_v42  ;;  %v2478_v39 = vmul.f32 %v4377_v22, %v2408_v25  ;;  %v2493_v11 = vadd.f32 %v2492_v31, %v2474_v0  ;;  %v2500_v51 = vadd.f32 %v2499_v14, %v2475_v10 }
 0x1d5   : > { %v2479_v20 = vmul.f32 %v4379_v2, %v2412_v57  ;;  %v2480_v54 = vmul.f32 %v4380_v45, %v2416_v18  ;;  %v2507_v63 = vadd.f32 %v2506_v12, %v2476_v43 }
 0x1d6   : > { %v4219_v52 = vadd.f32 %v2486_v23, %v2477_v24  ;;  %v4221_v27 = vadd.f32 %v2493_v11, %v2478_v39 }
 0x1d7   : > { %v4223_v37 = vadd.f32 %v2500_v51, %v2479_v20  ;;  %v4225_v42 = vadd.f32 %v2507_v63, %v2480_v54 }
 0x1d8   : > { %v2513_v25 = vmul.f32 %v4219_v52, %v4219_v52  ;;  %v2514_v21 = vmul.f32 %v4221_v27, %v4221_v27 }
 0x1d9   : > { %v2515_v57 = vmul.f32 %v4223_v37, %v4223_v37  ;;  %v2516_v18 = vmul.f32 %v4225_v42, %v4225_v42 }
 0x1da   : > { %v2517_v5 = vrot.slane %v2513_v25, 4  ;;  %v2523_v44 = vrot.slane %v2514_v21, 4 }
 0x1db   : > { %v2529_v38 = vrot.slane %v2515_v57, 4  ;;  %v2535_v7 = vrot.slane %v2516_v18, 4 }
 0x1dc   : > { %v2518_v16 = vadd.f32 %v2517_v5, %v2513_v25  ;;  %v2524_v17 = vadd.f32 %v2523_v44, %v2514_v21 }
 0x1dd   : > { %v2530_v29 = vadd.f32 %v2529_v38, %v2515_v57  ;;  %v2536_v34 = vadd.f32 %v2535_v7, %v2516_v18 }
 0x1de   : > { %v2519_v62 = vrot.slane %v2518_v16, 2  ;;  %v2525_v55 = vrot.slane %v2524_v17, 2 }
 0x1df   : > { %v2531_v1 = vrot.slane %v2530_v29, 2  ;;  %v2537_v61 = vrot.slane %v2536_v34, 2 }
 0x1e0   : > { %v2520_v59 = vadd.f32 %v2519_v62, %v2518_v16  ;;  %v2526_v53 = vadd.f32 %v2525_v55, %v2524_v17 }
 0x1e1   : > { %v2532_v9 = vadd.f32 %v2531_v1, %v2530_v29  ;;  %v2538_v48 = vadd.f32 %v2537_v61, %v2536_v34 }
 0x1e2   : > { %v2521_v50 = vrot.slane %v2520_v59, 1  ;;  %v2527_v19 = vrot.slane %v2526_v53, 1 }
 0x1e3   : > { %v2533_v36 = vrot.slane %v2532_v9, 1  ;;  %v2539_v13 = vrot.slane %v2538_v48, 1 }
 0x1e4   : > { %v2522_v47 = vadd.f32 %v2521_v50, %v2520_v59  ;;  %v2528_v56 = vadd.f32 %v2527_v19, %v2526_v53 }
 0x1e5   : > { %v2534_v30 = vadd.f32 %v2533_v36, %v2532_v9  ;;  %v2540_v26 = vadd.f32 %v2539_v13, %v2538_v48 }
 0x1e6   : > { %v2541_v49 = vadd.f32 1.0, %v2522_v47  ;;  %v2542_v40 = vadd.f32 1.0, %v2528_v56  ;;  %v2553_v15 = vadd.f32 1e-09, %v2522_v47  ;;  %v2554_v41 = vadd.f32 1e-09, %v2528_v56 }
 0x1e7   : > { %v2543_v46 = vadd.f32 1.0, %v2534_v30  ;;  %v2544_v32 = vadd.f32 1.0, %v2540_v26  ;;  %v2555_v0 = vadd.f32 1e-09, %v2534_v30  ;;  %v2556_v33 = vadd.f32 1e-09, %v2540_v26 }
 0x1e8   : > { %3198 = vrcp.f32 %v2541_v49 }
 0x1e9   : > { %3200 = vrcp.f32 %v2542_v40 }
 0x1ea   : > { %3202 = vrcp.f32 %v2543_v46 }
 0x1eb   : > { %3204 = vrcp.f32 %v2544_v32 }
 0x1ec   : > { %3206 = vrsqrt.f32 %v2553_v15 }
 0x1ed   : > { %3208 = vrsqrt.f32 %v2554_v41 }
 0x1ee   : > { %3210 = vrsqrt.f32 %v2555_v0 }
 0x1ef   : > { %3212 = vrsqrt.f32 %v2556_v33 }
 0x1f5   : > { %v3199_v31 = vpop.eup %3198 }
 0x1f6   : > { %v3201_v35 = vpop.eup %3200  ;;  %v2546_v28 = vmul.f32 %v3199_v31, %v2522_v47 }
 0x1f7   : > { %v3203_v10 = vpop.eup %3202  ;;  %v2548_v58 = vmul.f32 %v3201_v35, %v2528_v56 }
 0x1f8   : > { %v3205_v43 = vpop.eup %3204  ;;  %v2550_v14 = vmul.f32 %v3203_v10, %v2534_v30 }
 0x1f9   : > { %v3207_v12 = vpop.eup %3206  ;;  %v2552_v4 = vmul.f32 %v3205_v43, %v2540_v26 }
 0x1fa   : > { %v3209_v3 = vpop.eup %3208  ;;  %v2561_v24 = vmul.f32 %v3207_v12, %v2546_v28 }
 0x1fb   : > { %v3211_v22 = vpop.eup %3210  ;;  %v2562_v39 = vmul.f32 %v3209_v3, %v2548_v58 }
 0x1fc   : > { %v3213_v23 = vpop.eup %3212  ;;  %v2563_v11 = vmul.f32 %v3211_v22, %v2550_v14  ;;  %v2565_v60 = vmul.f32 %v2561_v24, %v4219_v52  }
 0x1fd   : > { %v2564_v2 = vmul.f32 %v3213_v23, %v2552_v4  ;;  %v2566_v20 = vmul.f32 %v2562_v39, %v4221_v27   ;;  %1480 = sbr.rel (!%p1478_p0) target bundleno = 283 (0x11b), region = 43 }
 0x1fe   : > { %v2567_v45 = vmul.f32 %v2563_v11, %v4223_v37   ;;  %v4384_v17 = vmov %v2565_v60  ;;  %2569 = vst [vmem:[#allocation4] sm:$0xff] (%p1478_p0), %v2565_v60 }
 0x1ff   : > { %v2568_v54 = vmul.f32 %v2564_v2, %v4225_v42   ;;  %v4383_v18 = vmov %v2566_v20  ;;  %2570 = vst [vmem:[#allocation4 + $0x8] sm:$0xff] (%p1478_p0), %v2566_v20 }
 0x200   : > { %v4382_v7 = vmov %v2567_v45  ;;  %2571 = vst [vmem:[#allocation4 + $0x10] sm:$0xff] (%p1478_p0), %v2567_v45 }
 0x201   : > { %v4381_v57 = vmov %v2568_v54  ;;  %2572 = vst [vmem:[#allocation4 + $0x18] sm:$0xff] (%p1478_p0), %v2568_v54 }
 0x202   :  { %3225 = shalt.err (!%p3222_p5)
}
 0x203   :  { %s3278_s8 = smov 128   ;;  %s3279_s9 = smov 8  }
 0x204   :  { %2584 = dma.vmem_to_hbm [thread:$0]  %s2579_s6, 512, %s4256_s3, [#allocation5], %s3278_s8, %s3278_s8, %s3279_s9  }
 0x205   :  { %3254 = dma.done.wait [#allocation5], 512  }
 0x206   :  { %3255 = vsyncadd [#allocation5], 4294966784 }
 0x207   :  { %2588 = vsyncpa [#allocation5], 1 }

</bundles_post_ra>
